<compile_context>
chip_gen: v5e
topology: v5e:2x2
jax: 0.10.0
libtpu: 0.0.40
codegen_flags: <defaults>
</compile_context>

<pallas_src>
import dataclasses
import functools

import jax
import jax.numpy as jnp
from jax import lax
from jax.experimental import pallas as pl
from jax.experimental.pallas import tpu as pltpu


@dataclasses.dataclass
class YoloHeadsAssignmentResult:
    assigned_labels: jax.Array       # (B, L)       int32
    assigned_bboxes: jax.Array       # (B, L, 4)    float32
    assigned_poses: jax.Array        # (B, L, K, 3) float32
    assigned_vertices: jax.Array     # (B, L, K, 3) float32
    assigned_rotations: jax.Array    # (B, L, 3, 3) float32
    assigned_scores: jax.Array       # (B, L, C)    float32
    assigned_gt_index: jax.Array     # (B, L)       int32 (flat, includes batch offset)


def _pow(x, p):
    p = float(p)
    if p == int(p):
        return x ** int(p)                      # lax.integer_pow (Mosaic-friendly)
    return jnp.power(x, jnp.float32(p))


def _assigner_kernel(gt_bboxes_ref, pred_bboxes_t_ref, pred_scores_ref,
                     gt_labels_ref, pad_mask_ref, anchors_t_ref,
                     out_ref, mp_ref, *, topk, alpha, beta, eps):
    gt_b = gt_bboxes_ref[0]            # (n, 4)
    prt = pred_bboxes_t_ref[0]         # (4, L)
    scores = pred_scores_ref[0]        # (L, C)
    labels = gt_labels_ref[0]          # (n, 1) int32
    pad = pad_mask_ref[0]              # (n, 1) f32
    anct = anchors_t_ref[...]          # (2, L)

    L, C = scores.shape
    n = pad.shape[0]

    # ---- per-gt class score gather on the MXU (idle otherwise):
    #      bbox_cls_scores[i, l] = scores[l, labels[i]] ----
    class_iota = lax.broadcasted_iota(jnp.int32, (n, C), 1)
    onehot_lbl = (labels == class_iota).astype(jnp.float32)            # (n, C)
    bbox_cls_scores = lax.dot_general(
        onehot_lbl, scores, (((1,), (1,)), ((), ())),
        preferred_element_type=jnp.float32)                            # (n, L)

    gx1 = gt_b[:, 0:1]; gy1 = gt_b[:, 1:2]; gx2 = gt_b[:, 2:3]; gy2 = gt_b[:, 3:4]  # (n,1)
    px1 = prt[0:1, :]; py1 = prt[1:2, :]; px2 = prt[2:3, :]; py2 = prt[3:4, :]      # (1,L)
    ax = anct[0:1, :]; ay = anct[1:2, :]                                            # (1,L)

    # ---- batch_iou_similarity(gt_bboxes, pred_bboxes) -> (n, L) ----
    ix1 = jnp.maximum(gx1, px1); iy1 = jnp.maximum(gy1, py1)
    ix2 = jnp.minimum(gx2, px2); iy2 = jnp.minimum(gy2, py2)
    overlap = jnp.maximum(ix2 - ix1, 0.0) * jnp.maximum(iy2 - iy1, 0.0)
    area_g = jnp.maximum(gx2 - gx1, 0.0) * jnp.maximum(gy2 - gy1, 0.0)   # (n,1)
    area_p = jnp.maximum(px2 - px1, 0.0) * jnp.maximum(py2 - py1, 0.0)   # (1,L)
    ious = overlap / (area_g + area_p - overlap + 1e-9)                  # (n,L)

    # ---- alignment metric ----
    alignment_metrics = _pow(bbox_cls_scores, alpha) * _pow(ious, beta)  # (n,L)

    # ---- check_points_inside_bboxes(anchor_points, gt_bboxes) -> (n, L) ----
    d_l = ax - gx1; d_t = ay - gy1; d_r = gx2 - ax; d_b = gy2 - ay
    dmin = jnp.minimum(jnp.minimum(d_l, d_t), jnp.minimum(d_r, d_b))
    is_in_gts = (dmin > 1e-9).astype(jnp.float32)

    # ---- gather_topk_anchors(alignment_metrics * is_in_gts, topk, topk_mask=pad) ----
    # Iterative argmax with first-index tie break.  The input is >= 0, so
    # membership in the top-k set is recovered from the -1e30 sentinel after
    # the loop (no accumulator carry).  Iotas are hoisted: JAX does not CSE
    # broadcast_in_dim and the loop is fully unrolled.
    lane_iota = lax.broadcasted_iota(jnp.int32, (n, L), 1)
    row_iota = lax.broadcasted_iota(jnp.int32, (n, L), 0)
    neg = jnp.float32(-1e30)

    def topk_body(_, cur):
        row_max = jnp.max(cur, axis=-1, keepdims=True)
        first_idx = jnp.min(jnp.where(cur == row_max, lane_iota, L),
                            axis=-1, keepdims=True)
        return jnp.where(lane_iota == first_idx, neg, cur)

    cur = lax.fori_loop(0, topk, topk_body,
                        alignment_metrics * is_in_gts, unroll=True)
    # Rows with all-zero metrics still get topk anchors marked; this matches
    # the torch reference when topk_mask=pad_gt_mask is supplied.
    is_in_topk = (cur < jnp.float32(-1e29)).astype(jnp.float32) * pad

    # is_in_topk already carries the pad mask.
    mask_positive = is_in_topk * is_in_gts
    mask_positive_sum = jnp.sum(mask_positive, axis=0, keepdims=True)     # (1, L)

    mp_ref[...] = mask_positive
    out_ref[0, 0:1, :] = mask_positive_sum

    # ---- resolve anchors assigned to multiple gts (skipped when none exist) ----
    @pl.when(jnp.max(mask_positive_sum) > 1.0)
    def _():
        col_max_iou = jnp.max(ious, axis=0, keepdims=True)
        first_max_row = jnp.min(jnp.where(ious == col_max_iou, row_iota, n),
                                axis=0, keepdims=True)
        is_max_iou = (row_iota == first_max_row).astype(jnp.float32)
        mp2 = jnp.where(mask_positive_sum > 1.0, is_max_iou, mask_positive)
        mp_ref[...] = mp2
        out_ref[0, 0:1, :] = jnp.sum(mp2, axis=0, keepdims=True)

    mask_positive = mp_ref[...]

    # ---- assigned_gt_index = argmax over gt axis (first maximal occurrence) ----
    col_max_mp = jnp.max(mask_positive, axis=0, keepdims=True)
    gt_index = jnp.min(jnp.where(mask_positive == col_max_mp, row_iota, n),
                       axis=0, keepdims=True)                             # (1, L) i32

    # ---- per-anchor score factor ----
    am = alignment_metrics * mask_positive
    max_metrics = jnp.max(am, axis=-1, keepdims=True)                     # (n, 1)
    max_ious = jnp.max(ious * mask_positive, axis=-1, keepdims=True)      # (n, 1)
    scale = max_ious / (max_metrics + eps)                                # (n, 1) exact
    am = am * scale
    score_factor = jnp.max(am, axis=0, keepdims=True)                     # (1, L)

    # ---- packed (8, L) output slab: direct full-lane row stores ----
    # gt_index stored as f32 (exact: gt_index < n << 2^24), cast back in the
    # wrapper; rows 3..7 are never written nor read.
    out_ref[0, 1:2, :] = score_factor
    out_ref[0, 2:3, :] = gt_index.astype(jnp.float32)


def yolo_heads_task_aligned_assigner(pred_scores, pred_bboxes, anchor_points,
                                     gt_labels, gt_bboxes, gt_poses, gt_vertices,
                                     gt_rotations, pad_gt_mask, bg_index,
                                     topk=13, alpha=1.0, beta=6.0, eps=1e-9):
    B, L, C = pred_scores.shape
    num_keypoints = gt_poses.shape[2]
    num_max_boxes = gt_bboxes.shape[1]

    if num_max_boxes == 0:
        return YoloHeadsAssignmentResult(
            assigned_labels=jnp.full((B, L), bg_index, dtype=jnp.int32),
            assigned_bboxes=jnp.zeros((B, L, 4), jnp.float32),
            assigned_poses=jnp.zeros((B, L, num_keypoints, 3), jnp.float32),
            assigned_vertices=jnp.zeros((B, L, num_keypoints, 3), jnp.float32),
            assigned_rotations=jnp.zeros((B, L, 3, 3), jnp.float32),
            assigned_scores=jnp.zeros((B, L, C), jnp.float32),
            assigned_gt_index=jnp.zeros((B, L), jnp.int32))

    n = num_max_boxes
    f32 = jnp.float32
    gt_labels_i32 = gt_labels.astype(jnp.int32)

    pred_bboxes_t = jnp.transpose(pred_bboxes, (0, 2, 1)).astype(f32)     # (B, 4, L)
    anchors_t = jnp.transpose(anchor_points, (1, 0)).astype(f32)          # (2, L)

    kernel = functools.partial(_assigner_kernel, topk=topk, alpha=alpha,
                               beta=beta, eps=eps)

    # Explicit VMEM budget: double-buffered input/output blocks plus ~20 live
    # (n, L) f32 temporaries (ious, metrics, is_in_gts, cur, masks, iotas,
    # scratch, ...).  Clamped well below the 64 MiB physical VMEM of v7x.
    nL = n * L
    io_elems = n * 4 + 4 * L + L * C + 2 * n + 2 * L + 8 * L
    vmem_bytes = int(4 * (2 * io_elems + 20 * nL) + (2 << 20))
    vmem_bytes = max(4 << 20, min(vmem_bytes, 100 << 20))

    packed = pl.pallas_call(
        kernel,
        out_shape=jax.ShapeDtypeStruct((B, 8, L), jnp.float32),
        grid_spec=pltpu.PrefetchScalarGridSpec(
            num_scalar_prefetch=0,
            grid=(B,),
            in_specs=[
                pl.BlockSpec((1, n, 4), lambda b: (b, 0, 0)),
                pl.BlockSpec((1, 4, L), lambda b: (b, 0, 0)),
                pl.BlockSpec((1, L, C), lambda b: (b, 0, 0)),
                pl.BlockSpec((1, n, 1), lambda b: (b, 0, 0)),
                pl.BlockSpec((1, n, 1), lambda b: (b, 0, 0)),
                pl.BlockSpec((2, L), lambda b: (0, 0)),
            ],
            out_specs=pl.BlockSpec((1, 8, L), lambda b: (b, 0, 0)),
            scratch_shapes=[pltpu.VMEM((n, L), jnp.float32)],
        ),
        compiler_params=pltpu.CompilerParams(
            dimension_semantics=("parallel",),
            vmem_limit_bytes=vmem_bytes),
    )(gt_bboxes.astype(f32), pred_bboxes_t, pred_scores.astype(f32),
      gt_labels_i32, pad_gt_mask.astype(f32), anchors_t)

    pos_sum = packed[:, 0, :]                        # (B, L)
    score_factor = packed[:, 1, :]                   # (B, L)
    gt_index = packed[:, 2, :].astype(jnp.int32)     # (B, L) local gt index

    # ---- glue: all per-anchor gathers fused into ONE one-hot matmul ----
    # (generic gathers lower poorly on TPU; an (L, n) x (n, D) matmul with
    #  one-hot lhs is exact at HIGHEST precision and trivially MXU-friendly).
    K3 = num_keypoints * 3
    onehot_pos = jax.nn.one_hot(gt_index, n, dtype=f32)                   # (B, L, n)
    attrs = jnp.concatenate([
        gt_labels_i32.astype(f32),                                        # (B, n, 1)
        gt_bboxes.astype(f32),                                            # (B, n, 4)
        gt_poses.astype(f32).reshape(B, n, K3),                           # (B, n, 3K)
        gt_vertices.astype(f32).reshape(B, n, K3),                        # (B, n, 3K)
        gt_rotations.astype(f32).reshape(B, n, 9),                        # (B, n, 9)
    ], axis=-1)                                                           # (B, n, D)
    gathered = jnp.einsum('bln,bnd->bld', onehot_pos, attrs,
                          precision=lax.Precision.HIGHEST)                # (B, L, D)

    assigned_labels_raw = jnp.round(gathered[..., 0]).astype(jnp.int32)
    assigned_bboxes = gathered[..., 1:5]
    assigned_poses = gathered[..., 5:5 + K3].reshape(B, L, num_keypoints, 3)
    assigned_vertices = gathered[..., 5 + K3:5 + 2 * K3].reshape(B, L, num_keypoints, 3)
    assigned_rotations = gathered[..., 5 + 2 * K3:5 + 2 * K3 + 9].reshape(B, L, 3, 3)

    assigned_labels = jnp.where(pos_sum > 0, assigned_labels_raw, jnp.int32(bg_index))

    # assigned_scores: equivalent to one_hot(labels, C+1) with the bg_index
    # column removed, built directly over C classes (no (C+1) intermediate).
    col = jnp.where(assigned_labels > bg_index, assigned_labels - 1, assigned_labels)
    valid = (assigned_labels != bg_index).astype(f32)
    assigned_scores = (jax.nn.one_hot(col, C, dtype=f32)
                       * (valid * score_factor)[..., None])

    assigned_gt_index = gt_index + jnp.arange(B, dtype=jnp.int32)[:, None] * n

    return YoloHeadsAssignmentResult(
        assigned_labels=assigned_labels,
        assigned_bboxes=assigned_bboxes,
        assigned_poses=assigned_poses,
        assigned_vertices=assigned_vertices,
        assigned_rotations=assigned_rotations,
        assigned_scores=assigned_scores,
        assigned_gt_index=assigned_gt_index,
    )


if __name__ == "__main__":
    B, L, C, n, K = 2, 128, 16, 8, 5
    bg_index = C   # background = num_classes

    key = jax.random.PRNGKey(0)
    ks = jax.random.split(key, 10)

    # 16x8 anchor grid (stride 1) -> L = 128 anchor points, xy format
    xs = jnp.arange(16, dtype=jnp.float32) + 0.5
    ys = jnp.arange(8, dtype=jnp.float32) + 0.5
    X, Y = jnp.meshgrid(xs, ys)
    anchor_points = jnp.stack([X.reshape(-1), Y.reshape(-1)], axis=-1)    # (128, 2)

    pred_scores = jax.random.uniform(ks[0], (B, L, C), jnp.float32)
    ctr = anchor_points[None] + jax.random.uniform(ks[1], (B, L, 2), minval=-0.5, maxval=0.5)
    wh = jax.random.uniform(ks[2], (B, L, 2), minval=1.0, maxval=4.0)
    pred_bboxes = jnp.concatenate([ctr - wh / 2, ctr + wh / 2], axis=-1)  # (B, L, 4) xyxy

    gxy = jax.random.uniform(ks[3], (B, n, 2), minval=0.0,
                             maxval=jnp.array([12.0, 4.0], jnp.float32))
    gwh = jax.random.uniform(ks[4], (B, n, 2), minval=2.0, maxval=5.0)
    gt_bboxes = jnp.concatenate([gxy, gxy + gwh], axis=-1)                # (B, n, 4)

    gt_labels = jax.random.randint(ks[5], (B, n, 1), 0, C, dtype=jnp.int32)
    gt_poses = jax.random.uniform(ks[6], (B, n, K, 3), jnp.float32)
    gt_vertices = jax.random.uniform(ks[7], (B, n, K, 3), jnp.float32)
    gt_rotations = jax.random.uniform(ks[8], (B, n, 3, 3), jnp.float32)

    valid_counts = jnp.array([5, 3], dtype=jnp.int32)                     # padded gts
    pad_gt_mask = (jnp.arange(n)[None, :] < valid_counts[:, None]
                   ).astype(jnp.float32)[..., None]                       # (B, n, 1)

    result = yolo_heads_task_aligned_assigner(
        pred_scores, pred_bboxes, anchor_points, gt_labels, gt_bboxes,
        gt_poses, gt_vertices, gt_rotations, pad_gt_mask, bg_index)

    jax.block_until_ready(jax.tree_util.tree_leaves(dataclasses.asdict(result)))
    print("KERNEL_OK")
</pallas_src>

<mosaic_0001>
module attributes {stable_mosaic.version = 11 : i64} {
  func.func @_assigner_kernel(%arg0: i32, %arg1: memref<1x8x4xf32, #tpu.memory_space<vmem>>, %arg2: memref<1x4x128xf32, #tpu.memory_space<vmem>>, %arg3: memref<1x128x16xf32, #tpu.memory_space<vmem>>, %arg4: memref<1x8x1xi32, #tpu.memory_space<vmem>>, %arg5: memref<1x8x1xf32, #tpu.memory_space<vmem>>, %arg6: memref<2x128xf32, #tpu.memory_space<vmem>>, %arg7: memref<1x8x128xf32, #tpu.memory_space<vmem>>, %arg8: memref<8x128xf32, #tpu.memory_space<vmem>>) attributes {dimension_semantics = [#tpu.dimension_semantics<parallel>], iteration_bounds = array<i64: 2>, scalar_prefetch = 0 : i64, scratch_operands = 1 : i64, tpu.core_type = #tpu.core_type<tc>, window_params = [{transform_indices = @transform_0, window_bounds = array<i64: 1, 8, 4>}, {transform_indices = @transform_1, window_bounds = array<i64: 1, 4, 128>}, {transform_indices = @transform_2, window_bounds = array<i64: 1, 128, 16>}, {transform_indices = @transform_3, window_bounds = array<i64: 1, 8, 1>}, {transform_indices = @transform_4, window_bounds = array<i64: 1, 8, 1>}, {pipeline_mode = #tpu.pipeline_mode<synchronous>, transform_indices = @transform_5, window_bounds = array<i64: 2, 128>}, {transform_indices = @transform_6, window_bounds = array<i64: 1, 8, 128>}]} {
    %c0 = arith.constant 0 : index
    %c0_0 = arith.constant 0 : index
    %c0_1 = arith.constant 0 : index
    %0 = vector.load %arg1[%c0, %c0_0, %c0_1] : memref<1x8x4xf32, #tpu.memory_space<vmem>>, vector<1x8x4xf32>
    %1 = vector.shape_cast %0 : vector<1x8x4xf32> to vector<8x4xf32>
    %c0_2 = arith.constant 0 : index
    %c0_3 = arith.constant 0 : index
    %c0_4 = arith.constant 0 : index
    %2 = vector.load %arg2[%c0_2, %c0_3, %c0_4] : memref<1x4x128xf32, #tpu.memory_space<vmem>>, vector<1x4x128xf32>
    %3 = vector.shape_cast %2 : vector<1x4x128xf32> to vector<4x128xf32>
    %c0_5 = arith.constant 0 : index
    %c0_6 = arith.constant 0 : index
    %c0_7 = arith.constant 0 : index
    %4 = vector.load %arg3[%c0_5, %c0_6, %c0_7] : memref<1x128x16xf32, #tpu.memory_space<vmem>>, vector<1x128x16xf32>
    %5 = vector.shape_cast %4 : vector<1x128x16xf32> to vector<128x16xf32>
    %c0_8 = arith.constant 0 : index
    %c0_9 = arith.constant 0 : index
    %c0_10 = arith.constant 0 : index
    %6 = vector.load %arg4[%c0_8, %c0_9, %c0_10] : memref<1x8x1xi32, #tpu.memory_space<vmem>>, vector<1x8x1xi32>
    %7 = vector.shape_cast %6 : vector<1x8x1xi32> to vector<8x1xi32>
    %c0_11 = arith.constant 0 : index
    %c0_12 = arith.constant 0 : index
    %c0_13 = arith.constant 0 : index
    %8 = vector.load %arg5[%c0_11, %c0_12, %c0_13] : memref<1x8x1xf32, #tpu.memory_space<vmem>>, vector<1x8x1xf32>
    %9 = vector.shape_cast %8 : vector<1x8x1xf32> to vector<8x1xf32>
    %c0_14 = arith.constant 0 : index
    %c0_15 = arith.constant 0 : index
    %10 = vector.load %arg6[%c0_14, %c0_15] : memref<2x128xf32, #tpu.memory_space<vmem>>, vector<2x128xf32>
    %11 = tpu.iota {dimensions = array<i32: 1>} : vector<8x16xi32>
    %12 = vector.broadcast %7 : vector<8x1xi32> to vector<8x16xi32>
    %13 = arith.cmpi eq, %12, %11 : vector<8x16xi32>
    %14 = arith.extui %13 : vector<8x16xi1> to vector<8x16xi32>
    %15 = arith.sitofp %14 : vector<8x16xi32> to vector<8x16xf32>
    %cst = arith.constant dense<0.000000e+00> : vector<8x128xf32>
    %16 = tpu.matmul %15, %5, %cst {dimension_numbers = #tpu.dot_dimension_numbers<[1], [1], [0], [0], [0, 0, 1, 0], [], []>} : vector<8x16xf32>, vector<128x16xf32>, vector<8x128xf32> -> vector<8x128xf32>
    %17 = vector.extract_strided_slice %1 {offsets = [0, 0], sizes = [8, 1], strides = [1, 1]} : vector<8x4xf32> to vector<8x1xf32>
    %18 = vector.extract_strided_slice %1 {offsets = [0, 1], sizes = [8, 1], strides = [1, 1]} : vector<8x4xf32> to vector<8x1xf32>
    %19 = vector.extract_strided_slice %1 {offsets = [0, 2], sizes = [8, 1], strides = [1, 1]} : vector<8x4xf32> to vector<8x1xf32>
    %20 = vector.extract_strided_slice %1 {offsets = [0, 3], sizes = [8, 1], strides = [1, 1]} : vector<8x4xf32> to vector<8x1xf32>
    %21 = vector.extract_strided_slice %3 {offsets = [0, 0], sizes = [1, 128], strides = [1, 1]} : vector<4x128xf32> to vector<1x128xf32>
    %22 = vector.extract_strided_slice %3 {offsets = [1, 0], sizes = [1, 128], strides = [1, 1]} : vector<4x128xf32> to vector<1x128xf32>
    %23 = vector.extract_strided_slice %3 {offsets = [2, 0], sizes = [1, 128], strides = [1, 1]} : vector<4x128xf32> to vector<1x128xf32>
    %24 = vector.extract_strided_slice %3 {offsets = [3, 0], sizes = [1, 128], strides = [1, 1]} : vector<4x128xf32> to vector<1x128xf32>
    %25 = vector.extract_strided_slice %10 {offsets = [0, 0], sizes = [1, 128], strides = [1, 1]} : vector<2x128xf32> to vector<1x128xf32>
    %26 = vector.extract_strided_slice %10 {offsets = [1, 0], sizes = [1, 128], strides = [1, 1]} : vector<2x128xf32> to vector<1x128xf32>
    %27 = vector.broadcast %17 : vector<8x1xf32> to vector<8x128xf32>
    %28 = vector.broadcast %21 : vector<1x128xf32> to vector<8x128xf32>
    %29 = arith.maximumf %27, %28 : vector<8x128xf32>
    %30 = vector.broadcast %18 : vector<8x1xf32> to vector<8x128xf32>
    %31 = vector.broadcast %22 : vector<1x128xf32> to vector<8x128xf32>
    %32 = arith.maximumf %30, %31 : vector<8x128xf32>
    %33 = vector.broadcast %19 : vector<8x1xf32> to vector<8x128xf32>
    %34 = vector.broadcast %23 : vector<1x128xf32> to vector<8x128xf32>
    %35 = arith.minimumf %33, %34 : vector<8x128xf32>
    %36 = vector.broadcast %20 : vector<8x1xf32> to vector<8x128xf32>
    %37 = vector.broadcast %24 : vector<1x128xf32> to vector<8x128xf32>
    %38 = arith.minimumf %36, %37 : vector<8x128xf32>
    %39 = arith.subf %35, %29 : vector<8x128xf32>
    %cst_16 = arith.constant 0.000000e+00 : f32
    %40 = vector.broadcast %cst_16 : f32 to vector<8x128xf32>
    %41 = arith.maximumf %39, %40 : vector<8x128xf32>
    %42 = arith.subf %38, %32 : vector<8x128xf32>
    %cst_17 = arith.constant 0.000000e+00 : f32
    %43 = vector.broadcast %cst_17 : f32 to vector<8x128xf32>
    %44 = arith.maximumf %42, %43 : vector<8x128xf32>
    %45 = arith.mulf %41, %44 : vector<8x128xf32>
    %46 = arith.subf %19, %17 : vector<8x1xf32>
    %cst_18 = arith.constant 0.000000e+00 : f32
    %47 = vector.broadcast %cst_18 : f32 to vector<8x1xf32>
    %48 = arith.maximumf %46, %47 : vector<8x1xf32>
    %49 = arith.subf %20, %18 : vector<8x1xf32>
    %cst_19 = arith.constant 0.000000e+00 : f32
    %50 = vector.broadcast %cst_19 : f32 to vector<8x1xf32>
    %51 = arith.maximumf %49, %50 : vector<8x1xf32>
    %52 = arith.mulf %48, %51 : vector<8x1xf32>
    %53 = arith.subf %23, %21 : vector<1x128xf32>
    %cst_20 = arith.constant 0.000000e+00 : f32
    %54 = vector.broadcast %cst_20 : f32 to vector<1x128xf32>
    %55 = arith.maximumf %53, %54 : vector<1x128xf32>
    %56 = arith.subf %24, %22 : vector<1x128xf32>
    %cst_21 = arith.constant 0.000000e+00 : f32
    %57 = vector.broadcast %cst_21 : f32 to vector<1x128xf32>
    %58 = arith.maximumf %56, %57 : vector<1x128xf32>
    %59 = arith.mulf %55, %58 : vector<1x128xf32>
    %60 = vector.broadcast %52 : vector<8x1xf32> to vector<8x128xf32>
    %61 = vector.broadcast %59 : vector<1x128xf32> to vector<8x128xf32>
    %62 = arith.addf %60, %61 : vector<8x128xf32>
    %63 = arith.subf %62, %45 : vector<8x128xf32>
    %cst_22 = arith.constant 9.99999971E-10 : f32
    %64 = vector.broadcast %cst_22 : f32 to vector<8x128xf32>
    %65 = arith.addf %63, %64 : vector<8x128xf32>
    %66 = arith.divf %45, %65 : vector<8x128xf32>
    %67 = arith.mulf %66, %66 : vector<8x128xf32>
    %68 = arith.mulf %67, %67 : vector<8x128xf32>
    %69 = arith.mulf %67, %68 : vector<8x128xf32>
    %70 = arith.mulf %16, %69 : vector<8x128xf32>
    %71 = vector.broadcast %25 : vector<1x128xf32> to vector<8x128xf32>
    %72 = vector.broadcast %17 : vector<8x1xf32> to vector<8x128xf32>
    %73 = arith.subf %71, %72 : vector<8x128xf32>
    %74 = vector.broadcast %26 : vector<1x128xf32> to vector<8x128xf32>
    %75 = vector.broadcast %18 : vector<8x1xf32> to vector<8x128xf32>
    %76 = arith.subf %74, %75 : vector<8x128xf32>
    %77 = vector.broadcast %19 : vector<8x1xf32> to vector<8x128xf32>
    %78 = vector.broadcast %25 : vector<1x128xf32> to vector<8x128xf32>
    %79 = arith.subf %77, %78 : vector<8x128xf32>
    %80 = vector.broadcast %20 : vector<8x1xf32> to vector<8x128xf32>
    %81 = vector.broadcast %26 : vector<1x128xf32> to vector<8x128xf32>
    %82 = arith.subf %80, %81 : vector<8x128xf32>
    %83 = arith.minimumf %73, %76 : vector<8x128xf32>
    %84 = arith.minimumf %79, %82 : vector<8x128xf32>
    %85 = arith.minimumf %83, %84 : vector<8x128xf32>
    %cst_23 = arith.constant 9.99999971E-10 : f32
    %86 = vector.broadcast %cst_23 : f32 to vector<8x128xf32>
    %87 = arith.cmpf ogt, %85, %86 : vector<8x128xf32>
    %88 = arith.extui %87 : vector<8x128xi1> to vector<8x128xi32>
    %89 = arith.sitofp %88 : vector<8x128xi32> to vector<8x128xf32>
    %90 = tpu.iota {dimensions = array<i32: 1>} : vector<8x128xi32>
    %91 = tpu.iota {dimensions = array<i32: 0>} : vector<8x128xi32>
    %92 = arith.mulf %70, %89 : vector<8x128xf32>
    %cst_24 = arith.constant -1.000000e+30 : f32
    %c0_i32 = arith.constant 0 : i32
    %cst_25 = arith.constant dense<0xFF800000> : vector<8xf32>
    %93 = vector.multi_reduction <maximumf>, %92, %cst_25 [1] : vector<8x128xf32> to vector<8xf32>
    %94 = vector.shape_cast %93 : vector<8xf32> to vector<8x1xf32>
    %95 = vector.broadcast %94 : vector<8x1xf32> to vector<8x128xf32>
    %96 = arith.cmpf oeq, %92, %95 : vector<8x128xf32>
    %c128_i32 = arith.constant 128 : i32
    %97 = vector.broadcast %c128_i32 : i32 to vector<8x128xi32>
    %98 = arith.select %96, %90, %97 : vector<8x128xi1>, vector<8x128xi32>
    %cst_26 = arith.constant dense<2147483647> : vector<8xi32>
    %99 = vector.multi_reduction <minsi>, %98, %cst_26 [1] : vector<8x128xi32> to vector<8xi32>
    %100 = vector.shape_cast %99 : vector<8xi32> to vector<8x1xi32>
    %101 = vector.broadcast %100 : vector<8x1xi32> to vector<8x128xi32>
    %102 = arith.cmpi eq, %90, %101 : vector<8x128xi32>
    %103 = vector.broadcast %cst_24 : f32 to vector<8x128xf32>
    %104 = arith.select %102, %103, %92 : vector<8x128xi1>, vector<8x128xf32>
    %c1_i32 = arith.constant 1 : i32
    %cst_27 = arith.constant dense<0xFF800000> : vector<8xf32>
    %105 = vector.multi_reduction <maximumf>, %104, %cst_27 [1] : vector<8x128xf32> to vector<8xf32>
    %106 = vector.shape_cast %105 : vector<8xf32> to vector<8x1xf32>
    %107 = vector.broadcast %106 : vector<8x1xf32> to vector<8x128xf32>
    %108 = arith.cmpf oeq, %104, %107 : vector<8x128xf32>
    %c128_i32_28 = arith.constant 128 : i32
    %109 = vector.broadcast %c128_i32_28 : i32 to vector<8x128xi32>
    %110 = arith.select %108, %90, %109 : vector<8x128xi1>, vector<8x128xi32>
    %cst_29 = arith.constant dense<2147483647> : vector<8xi32>
    %111 = vector.multi_reduction <minsi>, %110, %cst_29 [1] : vector<8x128xi32> to vector<8xi32>
    %112 = vector.shape_cast %111 : vector<8xi32> to vector<8x1xi32>
    %113 = vector.broadcast %112 : vector<8x1xi32> to vector<8x128xi32>
    %114 = arith.cmpi eq, %90, %113 : vector<8x128xi32>
    %115 = vector.broadcast %cst_24 : f32 to vector<8x128xf32>
    %116 = arith.select %114, %115, %104 : vector<8x128xi1>, vector<8x128xf32>
    %c2_i32 = arith.constant 2 : i32
    %cst_30 = arith.constant dense<0xFF800000> : vector<8xf32>
    %117 = vector.multi_reduction <maximumf>, %116, %cst_30 [1] : vector<8x128xf32> to vector<8xf32>
    %118 = vector.shape_cast %117 : vector<8xf32> to vector<8x1xf32>
    %119 = vector.broadcast %118 : vector<8x1xf32> to vector<8x128xf32>
    %120 = arith.cmpf oeq, %116, %119 : vector<8x128xf32>
    %c128_i32_31 = arith.constant 128 : i32
    %121 = vector.broadcast %c128_i32_31 : i32 to vector<8x128xi32>
    %122 = arith.select %120, %90, %121 : vector<8x128xi1>, vector<8x128xi32>
    %cst_32 = arith.constant dense<2147483647> : vector<8xi32>
    %123 = vector.multi_reduction <minsi>, %122, %cst_32 [1] : vector<8x128xi32> to vector<8xi32>
    %124 = vector.shape_cast %123 : vector<8xi32> to vector<8x1xi32>
    %125 = vector.broadcast %124 : vector<8x1xi32> to vector<8x128xi32>
    %126 = arith.cmpi eq, %90, %125 : vector<8x128xi32>
    %127 = vector.broadcast %cst_24 : f32 to vector<8x128xf32>
    %128 = arith.select %126, %127, %116 : vector<8x128xi1>, vector<8x128xf32>
    %c3_i32 = arith.constant 3 : i32
    %cst_33 = arith.constant dense<0xFF800000> : vector<8xf32>
    %129 = vector.multi_reduction <maximumf>, %128, %cst_33 [1] : vector<8x128xf32> to vector<8xf32>
    %130 = vector.shape_cast %129 : vector<8xf32> to vector<8x1xf32>
    %131 = vector.broadcast %130 : vector<8x1xf32> to vector<8x128xf32>
    %132 = arith.cmpf oeq, %128, %131 : vector<8x128xf32>
    %c128_i32_34 = arith.constant 128 : i32
    %133 = vector.broadcast %c128_i32_34 : i32 to vector<8x128xi32>
    %134 = arith.select %132, %90, %133 : vector<8x128xi1>, vector<8x128xi32>
    %cst_35 = arith.constant dense<2147483647> : vector<8xi32>
    %135 = vector.multi_reduction <minsi>, %134, %cst_35 [1] : vector<8x128xi32> to vector<8xi32>
    %136 = vector.shape_cast %135 : vector<8xi32> to vector<8x1xi32>
    %137 = vector.broadcast %136 : vector<8x1xi32> to vector<8x128xi32>
    %138 = arith.cmpi eq, %90, %137 : vector<8x128xi32>
    %139 = vector.broadcast %cst_24 : f32 to vector<8x128xf32>
    %140 = arith.select %138, %139, %128 : vector<8x128xi1>, vector<8x128xf32>
    %c4_i32 = arith.constant 4 : i32
    %cst_36 = arith.constant dense<0xFF800000> : vector<8xf32>
    %141 = vector.multi_reduction <maximumf>, %140, %cst_36 [1] : vector<8x128xf32> to vector<8xf32>
    %142 = vector.shape_cast %141 : vector<8xf32> to vector<8x1xf32>
    %143 = vector.broadcast %142 : vector<8x1xf32> to vector<8x128xf32>
    %144 = arith.cmpf oeq, %140, %143 : vector<8x128xf32>
    %c128_i32_37 = arith.constant 128 : i32
    %145 = vector.broadcast %c128_i32_37 : i32 to vector<8x128xi32>
    %146 = arith.select %144, %90, %145 : vector<8x128xi1>, vector<8x128xi32>
    %cst_38 = arith.constant dense<2147483647> : vector<8xi32>
    %147 = vector.multi_reduction <minsi>, %146, %cst_38 [1] : vector<8x128xi32> to vector<8xi32>
    %148 = vector.shape_cast %147 : vector<8xi32> to vector<8x1xi32>
    %149 = vector.broadcast %148 : vector<8x1xi32> to vector<8x128xi32>
    %150 = arith.cmpi eq, %90, %149 : vector<8x128xi32>
    %151 = vector.broadcast %cst_24 : f32 to vector<8x128xf32>
    %152 = arith.select %150, %151, %140 : vector<8x128xi1>, vector<8x128xf32>
    %c5_i32 = arith.constant 5 : i32
    %cst_39 = arith.constant dense<0xFF800000> : vector<8xf32>
    %153 = vector.multi_reduction <maximumf>, %152, %cst_39 [1] : vector<8x128xf32> to vector<8xf32>
    %154 = vector.shape_cast %153 : vector<8xf32> to vector<8x1xf32>
    %155 = vector.broadcast %154 : vector<8x1xf32> to vector<8x128xf32>
    %156 = arith.cmpf oeq, %152, %155 : vector<8x128xf32>
    %c128_i32_40 = arith.constant 128 : i32
    %157 = vector.broadcast %c128_i32_40 : i32 to vector<8x128xi32>
    %158 = arith.select %156, %90, %157 : vector<8x128xi1>, vector<8x128xi32>
    %cst_41 = arith.constant dense<2147483647> : vector<8xi32>
    %159 = vector.multi_reduction <minsi>, %158, %cst_41 [1] : vector<8x128xi32> to vector<8xi32>
    %160 = vector.shape_cast %159 : vector<8xi32> to vector<8x1xi32>
    %161 = vector.broadcast %160 : vector<8x1xi32> to vector<8x128xi32>
    %162 = arith.cmpi eq, %90, %161 : vector<8x128xi32>
    %163 = vector.broadcast %cst_24 : f32 to vector<8x128xf32>
    %164 = arith.select %162, %163, %152 : vector<8x128xi1>, vector<8x128xf32>
    %c6_i32 = arith.constant 6 : i32
    %cst_42 = arith.constant dense<0xFF800000> : vector<8xf32>
    %165 = vector.multi_reduction <maximumf>, %164, %cst_42 [1] : vector<8x128xf32> to vector<8xf32>
    %166 = vector.shape_cast %165 : vector<8xf32> to vector<8x1xf32>
    %167 = vector.broadcast %166 : vector<8x1xf32> to vector<8x128xf32>
    %168 = arith.cmpf oeq, %164, %167 : vector<8x128xf32>
    %c128_i32_43 = arith.constant 128 : i32
    %169 = vector.broadcast %c128_i32_43 : i32 to vector<8x128xi32>
    %170 = arith.select %168, %90, %169 : vector<8x128xi1>, vector<8x128xi32>
    %cst_44 = arith.constant dense<2147483647> : vector<8xi32>
    %171 = vector.multi_reduction <minsi>, %170, %cst_44 [1] : vector<8x128xi32> to vector<8xi32>
    %172 = vector.shape_cast %171 : vector<8xi32> to vector<8x1xi32>
    %173 = vector.broadcast %172 : vector<8x1xi32> to vector<8x128xi32>
    %174 = arith.cmpi eq, %90, %173 : vector<8x128xi32>
    %175 = vector.broadcast %cst_24 : f32 to vector<8x128xf32>
    %176 = arith.select %174, %175, %164 : vector<8x128xi1>, vector<8x128xf32>
    %c7_i32 = arith.constant 7 : i32
    %cst_45 = arith.constant dense<0xFF800000> : vector<8xf32>
    %177 = vector.multi_reduction <maximumf>, %176, %cst_45 [1] : vector<8x128xf32> to vector<8xf32>
    %178 = vector.shape_cast %177 : vector<8xf32> to vector<8x1xf32>
    %179 = vector.broadcast %178 : vector<8x1xf32> to vector<8x128xf32>
    %180 = arith.cmpf oeq, %176, %179 : vector<8x128xf32>
    %c128_i32_46 = arith.constant 128 : i32
    %181 = vector.broadcast %c128_i32_46 : i32 to vector<8x128xi32>
    %182 = arith.select %180, %90, %181 : vector<8x128xi1>, vector<8x128xi32>
    %cst_47 = arith.constant dense<2147483647> : vector<8xi32>
    %183 = vector.multi_reduction <minsi>, %182, %cst_47 [1] : vector<8x128xi32> to vector<8xi32>
    %184 = vector.shape_cast %183 : vector<8xi32> to vector<8x1xi32>
    %185 = vector.broadcast %184 : vector<8x1xi32> to vector<8x128xi32>
    %186 = arith.cmpi eq, %90, %185 : vector<8x128xi32>
    %187 = vector.broadcast %cst_24 : f32 to vector<8x128xf32>
    %188 = arith.select %186, %187, %176 : vector<8x128xi1>, vector<8x128xf32>
    %c8_i32 = arith.constant 8 : i32
    %cst_48 = arith.constant dense<0xFF800000> : vector<8xf32>
    %189 = vector.multi_reduction <maximumf>, %188, %cst_48 [1] : vector<8x128xf32> to vector<8xf32>
    %190 = vector.shape_cast %189 : vector<8xf32> to vector<8x1xf32>
    %191 = vector.broadcast %190 : vector<8x1xf32> to vector<8x128xf32>
    %192 = arith.cmpf oeq, %188, %191 : vector<8x128xf32>
    %c128_i32_49 = arith.constant 128 : i32
    %193 = vector.broadcast %c128_i32_49 : i32 to vector<8x128xi32>
    %194 = arith.select %192, %90, %193 : vector<8x128xi1>, vector<8x128xi32>
    %cst_50 = arith.constant dense<2147483647> : vector<8xi32>
    %195 = vector.multi_reduction <minsi>, %194, %cst_50 [1] : vector<8x128xi32> to vector<8xi32>
    %196 = vector.shape_cast %195 : vector<8xi32> to vector<8x1xi32>
    %197 = vector.broadcast %196 : vector<8x1xi32> to vector<8x128xi32>
    %198 = arith.cmpi eq, %90, %197 : vector<8x128xi32>
    %199 = vector.broadcast %cst_24 : f32 to vector<8x128xf32>
    %200 = arith.select %198, %199, %188 : vector<8x128xi1>, vector<8x128xf32>
    %c9_i32 = arith.constant 9 : i32
    %cst_51 = arith.constant dense<0xFF800000> : vector<8xf32>
    %201 = vector.multi_reduction <maximumf>, %200, %cst_51 [1] : vector<8x128xf32> to vector<8xf32>
    %202 = vector.shape_cast %201 : vector<8xf32> to vector<8x1xf32>
    %203 = vector.broadcast %202 : vector<8x1xf32> to vector<8x128xf32>
    %204 = arith.cmpf oeq, %200, %203 : vector<8x128xf32>
    %c128_i32_52 = arith.constant 128 : i32
    %205 = vector.broadcast %c128_i32_52 : i32 to vector<8x128xi32>
    %206 = arith.select %204, %90, %205 : vector<8x128xi1>, vector<8x128xi32>
    %cst_53 = arith.constant dense<2147483647> : vector<8xi32>
    %207 = vector.multi_reduction <minsi>, %206, %cst_53 [1] : vector<8x128xi32> to vector<8xi32>
    %208 = vector.shape_cast %207 : vector<8xi32> to vector<8x1xi32>
    %209 = vector.broadcast %208 : vector<8x1xi32> to vector<8x128xi32>
    %210 = arith.cmpi eq, %90, %209 : vector<8x128xi32>
    %211 = vector.broadcast %cst_24 : f32 to vector<8x128xf32>
    %212 = arith.select %210, %211, %200 : vector<8x128xi1>, vector<8x128xf32>
    %c10_i32 = arith.constant 10 : i32
    %cst_54 = arith.constant dense<0xFF800000> : vector<8xf32>
    %213 = vector.multi_reduction <maximumf>, %212, %cst_54 [1] : vector<8x128xf32> to vector<8xf32>
    %214 = vector.shape_cast %213 : vector<8xf32> to vector<8x1xf32>
    %215 = vector.broadcast %214 : vector<8x1xf32> to vector<8x128xf32>
    %216 = arith.cmpf oeq, %212, %215 : vector<8x128xf32>
    %c128_i32_55 = arith.constant 128 : i32
    %217 = vector.broadcast %c128_i32_55 : i32 to vector<8x128xi32>
    %218 = arith.select %216, %90, %217 : vector<8x128xi1>, vector<8x128xi32>
    %cst_56 = arith.constant dense<2147483647> : vector<8xi32>
    %219 = vector.multi_reduction <minsi>, %218, %cst_56 [1] : vector<8x128xi32> to vector<8xi32>
    %220 = vector.shape_cast %219 : vector<8xi32> to vector<8x1xi32>
    %221 = vector.broadcast %220 : vector<8x1xi32> to vector<8x128xi32>
    %222 = arith.cmpi eq, %90, %221 : vector<8x128xi32>
    %223 = vector.broadcast %cst_24 : f32 to vector<8x128xf32>
    %224 = arith.select %222, %223, %212 : vector<8x128xi1>, vector<8x128xf32>
    %c11_i32 = arith.constant 11 : i32
    %cst_57 = arith.constant dense<0xFF800000> : vector<8xf32>
    %225 = vector.multi_reduction <maximumf>, %224, %cst_57 [1] : vector<8x128xf32> to vector<8xf32>
    %226 = vector.shape_cast %225 : vector<8xf32> to vector<8x1xf32>
    %227 = vector.broadcast %226 : vector<8x1xf32> to vector<8x128xf32>
    %228 = arith.cmpf oeq, %224, %227 : vector<8x128xf32>
    %c128_i32_58 = arith.constant 128 : i32
    %229 = vector.broadcast %c128_i32_58 : i32 to vector<8x128xi32>
    %230 = arith.select %228, %90, %229 : vector<8x128xi1>, vector<8x128xi32>
    %cst_59 = arith.constant dense<2147483647> : vector<8xi32>
    %231 = vector.multi_reduction <minsi>, %230, %cst_59 [1] : vector<8x128xi32> to vector<8xi32>
    %232 = vector.shape_cast %231 : vector<8xi32> to vector<8x1xi32>
    %233 = vector.broadcast %232 : vector<8x1xi32> to vector<8x128xi32>
    %234 = arith.cmpi eq, %90, %233 : vector<8x128xi32>
    %235 = vector.broadcast %cst_24 : f32 to vector<8x128xf32>
    %236 = arith.select %234, %235, %224 : vector<8x128xi1>, vector<8x128xf32>
    %c12_i32 = arith.constant 12 : i32
    %cst_60 = arith.constant dense<0xFF800000> : vector<8xf32>
    %237 = vector.multi_reduction <maximumf>, %236, %cst_60 [1] : vector<8x128xf32> to vector<8xf32>
    %238 = vector.shape_cast %237 : vector<8xf32> to vector<8x1xf32>
    %239 = vector.broadcast %238 : vector<8x1xf32> to vector<8x128xf32>
    %240 = arith.cmpf oeq, %236, %239 : vector<8x128xf32>
    %c128_i32_61 = arith.constant 128 : i32
    %241 = vector.broadcast %c128_i32_61 : i32 to vector<8x128xi32>
    %242 = arith.select %240, %90, %241 : vector<8x128xi1>, vector<8x128xi32>
    %cst_62 = arith.constant dense<2147483647> : vector<8xi32>
    %243 = vector.multi_reduction <minsi>, %242, %cst_62 [1] : vector<8x128xi32> to vector<8xi32>
    %244 = vector.shape_cast %243 : vector<8xi32> to vector<8x1xi32>
    %245 = vector.broadcast %244 : vector<8x1xi32> to vector<8x128xi32>
    %246 = arith.cmpi eq, %90, %245 : vector<8x128xi32>
    %247 = vector.broadcast %cst_24 : f32 to vector<8x128xf32>
    %248 = arith.select %246, %247, %236 : vector<8x128xi1>, vector<8x128xf32>
    %cst_63 = arith.constant -1.000000e+29 : f32
    %249 = vector.broadcast %cst_63 : f32 to vector<8x128xf32>
    %250 = arith.cmpf olt, %248, %249 : vector<8x128xf32>
    %251 = arith.extui %250 : vector<8x128xi1> to vector<8x128xi32>
    %252 = arith.sitofp %251 : vector<8x128xi32> to vector<8x128xf32>
    %253 = vector.broadcast %9 : vector<8x1xf32> to vector<8x128xf32>
    %254 = arith.mulf %252, %253 : vector<8x128xf32>
    %255 = arith.mulf %254, %89 : vector<8x128xf32>
    %cst_64 = arith.constant dense<0.000000e+00> : vector<128xf32>
    %256 = vector.multi_reduction <add>, %255, %cst_64 [0] : vector<8x128xf32> to vector<128xf32>
    %257 = vector.shape_cast %256 : vector<128xf32> to vector<1x128xf32>
    %c0_65 = arith.constant 0 : index
    %c0_66 = arith.constant 0 : index
    %258 = vector.load %arg8[%c0_65, %c0_66] : memref<8x128xf32, #tpu.memory_space<vmem>>, vector<8x128xf32>
    tpu.vector_store %arg8[%c0_65, %c0_66], %255 {strides = array<i32>} : memref<8x128xf32, #tpu.memory_space<vmem>>, vector<8x128xf32>,
    %c0_67 = arith.constant 0 : index
    %c0_68 = arith.constant 0 : index
    %c0_69 = arith.constant 0 : index
    %259 = vector.load %arg7[%c0_67, %c0_68, %c0_69] : memref<1x8x128xf32, #tpu.memory_space<vmem>>, vector<1x1x128xf32>
    %260 = vector.shape_cast %259 : vector<1x1x128xf32> to vector<1x128xf32>
    %261 = vector.shape_cast %257 : vector<1x128xf32> to vector<1x1x128xf32>
    tpu.vector_store %arg7[%c0_67, %c0_68, %c0_69], %261 {strides = array<i32>} : memref<1x8x128xf32, #tpu.memory_space<vmem>>, vector<1x1x128xf32>,
    %262 = vector.shape_cast %257 : vector<1x128xf32> to vector<1x1x128xf32>
    %cst_70 = arith.constant dense<0xFF800000> : vector<1xf32>
    %263 = vector.multi_reduction <maximumf>, %262, %cst_70 [1, 2] : vector<1x1x128xf32> to vector<1xf32>
    %264 = vector.shape_cast %263 : vector<1xf32> to vector<1x1x1xf32>
    %265 = vector.extract %264[0, 0, 0] : f32 from vector<1x1x1xf32>
    %cst_71 = arith.constant 1.000000e+00 : f32
    %266 = arith.cmpf ogt, %265, %cst_71 : f32
    %267 = arith.extui %266 : i1 to i32
    %c0_i32_72 = arith.constant 0 : i32
    %268 = arith.cmpi ne, %267, %c0_i32_72 : i32
    scf.if %268 {
      %cst_86 = arith.constant dense<0xFF800000> : vector<128xf32>
      %298 = vector.multi_reduction <maximumf>, %66, %cst_86 [0] : vector<8x128xf32> to vector<128xf32>
      %299 = vector.shape_cast %298 : vector<128xf32> to vector<1x128xf32>
      %300 = vector.broadcast %299 : vector<1x128xf32> to vector<8x128xf32>
      %301 = arith.cmpf oeq, %66, %300 : vector<8x128xf32>
      %c8_i32_87 = arith.constant 8 : i32
      %302 = vector.broadcast %c8_i32_87 : i32 to vector<8x128xi32>
      %303 = arith.select %301, %91, %302 : vector<8x128xi1>, vector<8x128xi32>
      %cst_88 = arith.constant dense<2147483647> : vector<128xi32>
      %304 = vector.multi_reduction <minsi>, %303, %cst_88 [0] : vector<8x128xi32> to vector<128xi32>
      %305 = vector.shape_cast %304 : vector<128xi32> to vector<1x128xi32>
      %306 = vector.broadcast %305 : vector<1x128xi32> to vector<8x128xi32>
      %307 = arith.cmpi eq, %91, %306 : vector<8x128xi32>
      %308 = arith.extui %307 : vector<8x128xi1> to vector<8x128xi32>
      %309 = arith.sitofp %308 : vector<8x128xi32> to vector<8x128xf32>
      %cst_89 = arith.constant 1.000000e+00 : f32
      %310 = vector.broadcast %cst_89 : f32 to vector<1x128xf32>
      %311 = arith.cmpf ogt, %257, %310 : vector<1x128xf32>
      %312 = vector.shape_cast %311 : vector<1x128xi1> to vector<1x128xi1>
      %313 = vector.broadcast %312 : vector<1x128xi1> to vector<8x128xi1>
      %314 = arith.select %313, %309, %255 : vector<8x128xi1>, vector<8x128xf32>
      %c0_90 = arith.constant 0 : index
      %c0_91 = arith.constant 0 : index
      %315 = vector.load %arg8[%c0_90, %c0_91] : memref<8x128xf32, #tpu.memory_space<vmem>>, vector<8x128xf32>
      tpu.vector_store %arg8[%c0_90, %c0_91], %314 {strides = array<i32>} : memref<8x128xf32, #tpu.memory_space<vmem>>, vector<8x128xf32>,
      %cst_92 = arith.constant dense<0.000000e+00> : vector<128xf32>
      %316 = vector.multi_reduction <add>, %314, %cst_92 [0] : vector<8x128xf32> to vector<128xf32>
      %317 = vector.shape_cast %316 : vector<128xf32> to vector<1x128xf32>
      %c0_93 = arith.constant 0 : index
      %c0_94 = arith.constant 0 : index
      %c0_95 = arith.constant 0 : index
      %318 = vector.load %arg7[%c0_93, %c0_94, %c0_95] : memref<1x8x128xf32, #tpu.memory_space<vmem>>, vector<1x1x128xf32>
      %319 = vector.shape_cast %318 : vector<1x1x128xf32> to vector<1x128xf32>
      %320 = vector.shape_cast %317 : vector<1x128xf32> to vector<1x1x128xf32>
      tpu.vector_store %arg7[%c0_93, %c0_94, %c0_95], %320 {strides = array<i32>} : memref<1x8x128xf32, #tpu.memory_space<vmem>>, vector<1x1x128xf32>,
    } else {
    }
    %c0_73 = arith.constant 0 : index
    %c0_74 = arith.constant 0 : index
    %269 = vector.load %arg8[%c0_73, %c0_74] : memref<8x128xf32, #tpu.memory_space<vmem>>, vector<8x128xf32>
    %cst_75 = arith.constant dense<0xFF800000> : vector<128xf32>
    %270 = vector.multi_reduction <maximumf>, %269, %cst_75 [0] : vector<8x128xf32> to vector<128xf32>
    %271 = vector.shape_cast %270 : vector<128xf32> to vector<1x128xf32>
    %272 = vector.broadcast %271 : vector<1x128xf32> to vector<8x128xf32>
    %273 = arith.cmpf oeq, %269, %272 : vector<8x128xf32>
    %c8_i32_76 = arith.constant 8 : i32
    %274 = vector.broadcast %c8_i32_76 : i32 to vector<8x128xi32>
    %275 = arith.select %273, %91, %274 : vector<8x128xi1>, vector<8x128xi32>
    %cst_77 = arith.constant dense<2147483647> : vector<128xi32>
    %276 = vector.multi_reduction <minsi>, %275, %cst_77 [0] : vector<8x128xi32> to vector<128xi32>
    %277 = vector.shape_cast %276 : vector<128xi32> to vector<1x128xi32>
    %278 = arith.mulf %70, %269 : vector<8x128xf32>
    %cst_78 = arith.constant dense<0xFF800000> : vector<8xf32>
    %279 = vector.multi_reduction <maximumf>, %278, %cst_78 [1] : vector<8x128xf32> to vector<8xf32>
    %280 = vector.shape_cast %279 : vector<8xf32> to vector<8x1xf32>
    %281 = arith.mulf %66, %269 : vector<8x128xf32>
    %cst_79 = arith.constant dense<0xFF800000> : vector<8xf32>
    %282 = vector.multi_reduction <maximumf>, %281, %cst_79 [1] : vector<8x128xf32> to vector<8xf32>
    %283 = vector.shape_cast %282 : vector<8xf32> to vector<8x1xf32>
    %cst_80 = arith.constant 9.99999971E-10 : f32
    %284 = vector.broadcast %cst_80 : f32 to vector<8x1xf32>
    %285 = arith.addf %280, %284 : vector<8x1xf32>
    %286 = arith.divf %283, %285 : vector<8x1xf32>
    %287 = vector.broadcast %286 : vector<8x1xf32> to vector<8x128xf32>
    %288 = arith.mulf %278, %287 : vector<8x128xf32>
    %cst_81 = arith.constant dense<0xFF800000> : vector<128xf32>
    %289 = vector.multi_reduction <maximumf>, %288, %cst_81 [0] : vector<8x128xf32> to vector<128xf32>
    %290 = vector.shape_cast %289 : vector<128xf32> to vector<1x128xf32>
    %c0_82 = arith.constant 0 : index
    %c1 = arith.constant 1 : index
    %c0_83 = arith.constant 0 : index
    %291 = vector.load %arg7[%c0_82, %c1, %c0_83] : memref<1x8x128xf32, #tpu.memory_space<vmem>>, vector<1x1x128xf32>
    %292 = vector.shape_cast %291 : vector<1x1x128xf32> to vector<1x128xf32>
    %293 = vector.shape_cast %290 : vector<1x128xf32> to vector<1x1x128xf32>
    tpu.vector_store %arg7[%c0_82, %c1, %c0_83], %293 {strides = array<i32>} : memref<1x8x128xf32, #tpu.memory_space<vmem>>, vector<1x1x128xf32>,
    %294 = arith.sitofp %277 : vector<1x128xi32> to vector<1x128xf32>
    %c0_84 = arith.constant 0 : index
    %c2 = arith.constant 2 : index
    %c0_85 = arith.constant 0 : index
    %295 = vector.load %arg7[%c0_84, %c2, %c0_85] : memref<1x8x128xf32, #tpu.memory_space<vmem>>, vector<1x1x128xf32>
    %296 = vector.shape_cast %295 : vector<1x1x128xf32> to vector<1x128xf32>
    %297 = vector.shape_cast %294 : vector<1x128xf32> to vector<1x1x128xf32>
    tpu.vector_store %arg7[%c0_84, %c2, %c0_85], %297 {strides = array<i32>} : memref<1x8x128xf32, #tpu.memory_space<vmem>>, vector<1x1x128xf32>,
    return
  }
  func.func @transform_0(%arg0: i32) -> (i32, i32, i32) {
    %c0_i32 = arith.constant 0 : i32
    %c0_i32_0 = arith.constant 0 : i32
    %c0_i32_1 = arith.constant 0 : i32
    return %arg0, %c0_i32, %c0_i32_0 : i32, i32, i32
  }
  func.func @transform_1(%arg0: i32) -> (i32, i32, i32) {
    %c0_i32 = arith.constant 0 : i32
    %c0_i32_0 = arith.constant 0 : i32
    %c0_i32_1 = arith.constant 0 : i32
    return %arg0, %c0_i32, %c0_i32_0 : i32, i32, i32
  }
  func.func @transform_2(%arg0: i32) -> (i32, i32, i32) {
    %c0_i32 = arith.constant 0 : i32
    %c0_i32_0 = arith.constant 0 : i32
    %c0_i32_1 = arith.constant 0 : i32
    return %arg0, %c0_i32, %c0_i32_0 : i32, i32, i32
  }
  func.func @transform_3(%arg0: i32) -> (i32, i32, i32) {
    %c0_i32 = arith.constant 0 : i32
    %c0_i32_0 = arith.constant 0 : i32
    %c0_i32_1 = arith.constant 0 : i32
    return %arg0, %c0_i32, %c0_i32_0 : i32, i32, i32
  }
  func.func @transform_4(%arg0: i32) -> (i32, i32, i32) {
    %c0_i32 = arith.constant 0 : i32
    %c0_i32_0 = arith.constant 0 : i32
    %c0_i32_1 = arith.constant 0 : i32
    return %arg0, %c0_i32, %c0_i32_0 : i32, i32, i32
  }
  func.func @transform_5(%arg0: i32) -> (i32, i32) {
    %c0_i32 = arith.constant 0 : i32
    %c0_i32_0 = arith.constant 0 : i32
    %c0_i32_1 = arith.constant 0 : i32
    return %c0_i32, %c0_i32_0 : i32, i32
  }
  func.func @transform_6(%arg0: i32) -> (i32, i32, i32) {
    %c0_i32 = arith.constant 0 : i32
    %c0_i32_0 = arith.constant 0 : i32
    %c0_i32_1 = arith.constant 0 : i32
    return %arg0, %c0_i32, %c0_i32_0 : i32, i32, i32
  }
}

</mosaic_0001>

<bundles_post_ra>
// kernel: tpu_custom_call.1
= control target key start
LH: loop header
LB: loop body
LE: loop exit
PB: predicated region body
PF: predicated region fallthrough
CT: control target
= control target key end

     0   :  { %11 = vsyncpa [#allocation4], 0  ;;  %s1419_s0 = inlined_call_operand.vmem [shape: f32[2,8,4], index: 0, kind: input, shape index: {}]   ;;  %s1420_s1 = inlined_call_operand.vmem [shape: f32[2,4,128], index: 1, kind: input, shape index: {}]   ;;  %s1421_s2 = inlined_call_operand.vmem [shape: f32[2,128,16], index: 2, kind: input, shape index: {}]   ;;  %s1422_s3 = inlined_call_operand.vmem [shape: s32[2,8,1], index: 3, kind: input, shape index: {}]   ;;  %s1423_s4 = inlined_call_operand.vmem [shape: f32[2,8,1], index: 4, kind: input, shape index: {}]   ;;  %s1424_s5 = inlined_call_operand.vmem [shape: f32[2,128], index: 5, kind: input, shape index: {}]   ;;  %s1425_s6 = inlined_call_operand.hbm [shape: f32[2,8,128], index: 6, kind: output, shape index: {}]  }
   0x1   :  { %13 = vsyncpa [#allocation4 + $0x1], 0  ;;  %s1206_s21 = smov 0   ;;  %s1208_s22 = smov 0  }
   0x2   :  { %s1210_s23 = smov 0   ;;  %s1212_s24 = smov 0  }
   0x3 LB: > { %s1227_s25 = sadd.s32 4294967295, %s1161_s24   ;;  %s1001_s26 = sadd.s32 4294967294, %s1161_s24   ;;  %s1161_s24 = sphi %s1212_s24, %s1431_s24   ;;  %s1157_s23 = sphi %s1210_s23, %s1430_s23   ;;  %s1153_s22 = sphi %s1208_s22, %s1429_s22   ;;  %s1149_s21 = sphi %s1206_s21, %s1428_s21  }
   0x4   : > { %s1231_s27 = sadd.s32 1, %s1161_s24   ;;  %s177_s28 = sadd.s32 1, %s1157_s23 }
   0x5   : > { %s174_s29 = ssub.s32 %s1161_s24, %s1231_s27  ;;  %p187_p0 = scmp.ne.s32.totalorder %s1157_s23, %s1153_s22 }
   0x6   : > { %p175_p1 = scmp.eq.s32.totalorder %s174_s29, 0  ;;  %p188_p2 = scmp.eq.s32.totalorder %s1227_s25, 1 }
   0x7   : > { %p193_p3 = scmp.ne.s32.totalorder %s1153_s22, %s1149_s21  ;;  %p194_p4 = scmp.eq.s32.totalorder %s1001_s26, 1 }
   0x8   : > { %s1242_s30 = scalar_select %p175_p1, %s1157_s23, %s177_s28  }
   0x9   : > { %p1244_p5 = por %p188_p2, %p187_p0  ;;  %p1248_p6 = por %p194_p4, %p193_p3 }
   0xa   : > { %p1004_p7 = scmp.ge.s32.totalorder %s1161_s24, 1  ;;  %p251_p8 = scmp.lt.s32.totalorder %s1161_s24, 3 }
   0xc   : > { %p252_p9 = pnand %p1004_p7, %p251_p8 }
   0xd   : > { %p297_p10 = scmp.lt.s32.totalorder (!%p252_p9), %s1227_s25, 1  ;;  %s1164_s26 = smov (!%p252_p9), 2  }
   0xe   : > { %255 = sbr.rel (%p252_p9) target bundleno = 5508 (0x1584), region = 44  ;;  %s1167_s28 = smov (!%p252_p9), 127  }
  0x13   : > { %v1163_v0 = vmov 0   ;;  %s1258_s9 = scalar_select %p297_p10, %s1227_s25, 1  ;;  %vm347_vm0 = vcmask 130048   ;;  %v339_v11 = vlaneseq  ;;  %v1165_v21 = vmov 3   ;;  %v338_v61 = vld [vmem:[%s1424_s5] sm:$0x3] }
  0x14   : > { %1087 = vset.pattern.permute.xlu0 %v1163_v0  ;;  %1088 = vset.pattern.permute.xlu1 %v1163_v0  ;;  %v1166_v24 = vmov 0.0   ;;  %v1168_v29 = vmov 1   ;;  %v1169_v30 = vmov 2   ;;  %v498_v63 = vperm.slane %v338_v61, 1 }
  0x15   : > { %s1261_s10 = sshll.u32 %s1258_s9, 3  ;;  %s1037_s11 = sshll.u32 %s1258_s9, 7  ;;  %v1294_v13 = vshrl.u32 %v339_v11, 7  ;;  %v1312_v22 = vand.u32 127, %v339_v11  ;;  %1089 = vset.pattern.permute.xlu2 %v1168_v29 }
  0x16   : > { %s1267_s14 = scalar_lea.vmem %s1421_s2, %s1037_s11  ;;  %s313_s17 = scalar_lea.vmem %s1422_s3, %s1261_s10 }
  0x17   : > { %v336_v1 = vld [vmem:[%s313_s17] sm:$0xff]  ;;  %v335_v2 = vld [vmem:[%s1267_s14 + $0x78] sm:$0xff]  ;;  %v334_v3 = vld [vmem:[%s1267_s14 + $0x70] sm:$0xff]  ;;  %s300_s20 = scalar_lea.vmem %s1419_s0, %s1261_s10  ;;  %s1007_s29 = sshll.u32 %s1258_s9, 2 }
  0x18   : > { %342 = vperm.xlu0 %1087, %v336_v1   ;;  %1013 = vmatpush.xpose.msk.msra.mxu0 %vm347_vm0, %v335_v2  ;;  %v318_v4 = vld [vmem:[%s300_s20] sm:$0xff]  ;;  %v333_v5 = vld [vmem:[%s1267_s14 + $0x68] sm:$0xff]  ;;  %v331_v7 = vld [vmem:[%s1267_s14 + $0x58] sm:$0xff]  ;;  %s304_s13 = scalar_lea.vmem %s1420_s1, %s1007_s29  ;;  %s317_s17 = scalar_lea.vmem %s1423_s4, %s1261_s10 }
  0x19   : > { %v332_v6 = vld [vmem:[%s1267_s14 + $0x60] sm:$0xff]  ;;  %v330_v8 = vld [vmem:[%s1267_s14 + $0x50] sm:$0xff]  ;;  %v329_v9 = vld [vmem:[%s1267_s14 + $0x48] sm:$0xff]  ;;  %427 = vperm.xlu2 %1089, %v318_v4   ;;  %s294_s10 = sand.u32 1, %s1153_s22  }
  0x1a   : > { %v328_v10 = vld [vmem:[%s1267_s14 + $0x40] sm:$0xff]  ;;  %v327_v12 = vld [vmem:[%s1267_s14 + $0x38] sm:$0xff]  ;;  %v326_v14 = vld [vmem:[%s1267_s14 + $0x30] sm:$0xff]  ;;  %s1005_s18 = sshll.u32 %s294_s10, 3 }
  0x1b   : > { %v325_v15 = vld [vmem:[%s1267_s14 + $0x28] sm:$0xff]  ;;  %v324_v16 = vld [vmem:[%s1267_s14 + $0x20] sm:$0xff]  ;;  %v323_v17 = vld [vmem:[%s1267_s14 + $0x18] sm:$0xff]  ;;  %s1371_s19 = scalar_lea.vmem [#allocation3], %s1005_s18 }
  0x1c   : > { %1014 = vmatpush.xpose.msk.msra.mxu0 %vm347_vm0, %v334_v3  ;;  %v322_v18 = vld [vmem:[%s1267_s14 + $0x10] sm:$0xff]  ;;  %v321_v19 = vld [vmem:[%s1267_s14 + $0x8] sm:$0xff]  ;;  %v320_v20 = vld [vmem:[%s1267_s14] sm:$0xff] }
  0x1d   : > { %v319_v33 = vld [vmem:[%s304_s13] sm:$0xf] }
  0x1e   : > { %v460_v35 = vrot.slane %v319_v33, 6  ;;  %v424_v37 = vperm.slane %v319_v33, 0  ;;  %v430_v38 = vperm.slane %v319_v33, 1  ;;  %v436_v39 = vperm.slane %v319_v33, 2 }
  0x1f   : > { %v442_v41 = vperm.slane %v319_v33, 3 }
  0x20   : > { %449 = vrot.lane.b32.xlu0 %v318_v4, %s1164_s26  ;;  %1015 = vmatpush.xpose.msk.msra.mxu0 %vm347_vm0, %v333_v5  ;;  %v462_v36 = vsub.f32 %v319_v33, %v460_v35 }
  0x21   : > { %1091 = vset.pattern.permute.xlu0 %v1165_v21  ;;  %1090 = vset.pattern.permute.xlu2 %v1169_v30 }
  0x22   : > { %433 = vperm.xlu2 %1090, %v318_v4   ;;  %v463_v42 = vmax.f32 %v462_v36, 0.0 }
  0x24   : > { %1016 = vmatpush.xpose.msk.msra.mxu0 %vm347_vm0, %v332_v6  ;;  %v465_v49 = vrot.slane %v463_v42, 1 }
  0x26   : > { %v467_v52 = vmul.f32 %v465_v49, %v463_v42 }
  0x28   : > { %1017 = vmatpush.xpose.msk.msra.mxu0 %vm347_vm0, %v331_v7  ;;  %439 = vperm.xlu0 %1091, %v318_v4   ;;  %v473_v55 = vperm.slane %v467_v52, 2 }
  0x2a   : > { %1093 = vset.pattern.permute.xlu2 %v1163_v0 }
  0x2c   : > { %1018 = vmatpush.xpose.msk.msra.mxu0 %vm347_vm0, %v330_v8 }
  0x30   : > { %1019 = vmatpush.xpose.msk.msra.mxu0 %vm347_vm0, %v329_v9  ;;  %1094 = vset.pattern.permute.xlu0 %v1163_v0  ;;  %v496_v0 = vperm.slane %v338_v61, 0 }
  0x34   : > { %1020 = vmatpush.xpose.msk.msra.mxu0 %vm347_vm0, %v328_v10 }
  0x38   : > { %1021 = vmatpush.xpose.msk.msra.mxu0 %vm347_vm0, %v327_v12 }
  0x3c   : > { %1022 = vmatpush.xpose.msk.msra.mxu0 %vm347_vm0, %v326_v14 }
  0x40   : > { %1023 = vmatpush.xpose.msk.msra.mxu0 %vm347_vm0, %v325_v15 }
  0x44   : > { %1024 = vmatpush.xpose.msk.msra.mxu0 %vm347_vm0, %v324_v16 }
  0x48   : > { %1025 = vmatpush.xpose.msk.msra.mxu0 %vm347_vm0, %v323_v17 }
  0x4c   : > { %1026 = vmatpush.xpose.msk.msra.mxu0 %vm347_vm0, %v322_v18 }
  0x50   : > { %1027 = vmatpush.xpose.msk.msra.mxu0 %vm347_vm0, %v321_v19 }
  0x54   : > { %1028 = vmatpush.xpose.msk.msra.mxu0 %vm347_vm0, %v320_v20 }
  0x73   : > { %v428_v34 = vpop.permute.xlu2 %427 }
  0x74   : > { %v431_v46 = vmax.f32 %v428_v34, %v430_v38  ;;  %v499_v3 = vsub.f32 %v498_v63, %v428_v34 }
  0x7c   : > { %v434_v43 = vpop.permute.xlu2 %433 }
  0x7d   : > { %v437_v47 = vmin.f32 %v434_v43, %v436_v39  ;;  %v500_v7 = vsub.f32 %v434_v43, %v496_v0 }
  0x8a   : > { %v343_v23 = vpop.permute.xlu0 %342 }
  0x8b   : > { %vm344_vm1 = vcmp.eq.s32.totalorder %v343_v23, %v1312_v22 }
  0x8c   : > { %v1012_v25 = vsel %vm344_vm1, 1.0, %v1166_v24 }
  0x8d   : > { %1029 = vmatmul.msk.f32.vlgmr.msra.gmra.mxu0 %vm347_vm0, %v1012_v25 }
  0x92   : > { %v450_v26 = vpop.permute.xlu0 %449 }
  0x93   : > { %v452_v27 = vsub.f32 %v318_v4, %v450_v26 }
  0x95   : > { %v453_v28 = vmax.f32 %v452_v27, 0.0 }
  0x97   : > { %455 = vrot.lane.b32.xlu1 %v453_v28, %s1167_s28 }
  0x9a   : > { %v440_v44 = vpop.permute.xlu0 %439 }
  0x9b   : > { %v443_v48 = vmin.f32 %v440_v44, %v442_v41  ;;  %v501_v5 = vsub.f32 %v440_v44, %v498_v63 }
  0x9d   : > { %v446_v51 = vsub.f32 %v443_v48, %v431_v46  ;;  %v503_v14 = vmin.f32 %v500_v7, %v501_v5 }
  0x9f   : > { %421 = vperm.xlu1 %1088, %v318_v4   ;;  %v447_v54 = vmax.f32 %v446_v51, 0.0 }
  0xa7   : > { %1092 = vset.pattern.permute.xlu1 %v1169_v30 }
 0x109   : > { %v456_v31 = vpop.permute.xlu1 %455 }
 0x10a   : > { %v458_v32 = vmul.f32 %v456_v31, %v453_v28  ;;  %v416_v23 = vpop.f32.mrf.mxu0 }
 0x10c   : > { %470 = vperm.xlu1 %1092, %v458_v32  }
 0x111   : > { %v422_v40 = vpop.permute.xlu1 %421 }
 0x112   : > { %v425_v45 = vmax.f32 %v422_v40, %v424_v37  ;;  %v497_v4 = vsub.f32 %v496_v0, %v422_v40 }
 0x114   : > { %v444_v50 = vsub.f32 %v437_v47, %v425_v45  ;;  %v502_v12 = vmin.f32 %v497_v4, %v499_v3 }
 0x116   : > { %v445_v53 = vmax.f32 %v444_v50, 0.0  ;;  %v504_v18 = vmin.f32 %v502_v12, %v503_v14 }
 0x118   : > { %v448_v57 = vmul.f32 %v447_v54, %v445_v53  ;;  %vm505_vm6 = vcmp.gt.f32.partialorder %v504_v18, 1e-09 }
 0x119   : > { %v1332_v26 = vsel %vm505_vm6, 1.0, %v1166_v24 }
 0x17e   : > { %v471_v56 = vpop.permute.xlu1 %470 }
 0x17f   : > { %v474_v58 = vadd.f32 %v473_v55, %v471_v56 }
 0x181   : > { %v475_v59 = vsub.f32 %v474_v58, %v448_v57 }
 0x183   : > { %v476_v60 = vadd.f32 1e-09, %v475_v59 }
 0x185   : > { %1095 = vrcp.f32 %v476_v60  ;;  %v488_v6 = vand.u32 2147483648, %v476_v60  ;;  %v486_v9 = vand.u32 2147483647, %v476_v60  ;;  %vm482_vm3 = vweird.f32 %v476_v60 }
 0x187   : > { %v489_v11 = vor.u32 1.1754944e-38, %v488_v6  ;;  %vm487_vm5 = vcmp.eq.f32.partialorder %v486_v9, 8.507059e+37 }
 0x18b   : > { %v1096_v62 = vpop.eup %1095 }
 0x18c   : > { %v478_v1 = vmul.f32 %v1096_v62, %v476_v60  ;;  %vm483_vm2 = vweird.f32 %v1096_v62 }
 0x18d   : > { %vm484_vm4 = vmor %vm482_vm3, %vm483_vm2 }
 0x18e   : > { %v479_v2 = vsub.f32 1.0, %v478_v1 }
 0x190   : > { %v480_v8 = vmul.f32 %v1096_v62, %v479_v2 }
 0x192   : > { %v481_v10 = vadd.f32 %v1096_v62, %v480_v8 }
 0x194   : > { %v485_v15 = vsel %vm484_vm4, %v1096_v62, %v481_v10 }
 0x195   : > { %v490_v16 = vsel %vm487_vm5, %v489_v11, %v485_v15 }
 0x196   : > { %v1325_v17 = vmul.f32 %v490_v16, %v448_v57 }
 0x198   : > { %v492_v19 = vmul.f32 %v1325_v17, %v1325_v17 }
 0x19a   : > { %v493_v20 = vmul.f32 %v492_v19, %v492_v19 }
 0x19c   : > { %v494_v21 = vmul.f32 %v493_v20, %v492_v19 }
 0x19e   : > { %v1329_v25 = vmul.f32 %v494_v21, %v416_v23 }
 0x1a0   : > { %v510_v27 = vmul.f32 %v1332_v26, %v1329_v25 }
 0x1a2   : > { %511 = vmax.xlane.f32.xlu2 %v510_v27 }
 0x215   : > { %v512_v28 = vpop.xlane.xlu2 %511 }
 0x216   : > { %vm513_vm7 = vcmp.eq.f32.partialorder %v510_v27, %v512_v28 }
 0x217   : > { %v514_v29 = vsel %vm513_vm7, %v1312_v22, 128 }
 0x218   : > { %v516_v30 = vshra.s32 %v514_v29, 16  ;;  %v515_v32 = vand.u32 65535, %v514_v29 }
 0x21a   : > { %v518_v31 = vcvt.s32.f32 %v516_v30  ;;  %v517_v34 = vcvt.s32.f32 %v515_v32 }
 0x21c   : > { %519 = vmin.xlane.f32.xlu1 %v518_v31 }
 0x28f   : > { %v520_v33 = vpop.xlane.xlu1 %519 }
 0x290   : > { %vm521_vm8 = vcmp.eq.f32.partialorder %v518_v31, %v520_v33  ;;  %v526_v36 = vcvt.f32.s32 %v520_v33 }
 0x291   : > { %v522_v35 = vsel %vm521_vm8, %v517_v34, inf }
 0x292   : > { %523 = vmin.xlane.f32.xlu0 %v522_v35  ;;  %v527_v38 = vshll.u32 %v526_v36, 16 }
 0x305   : > { %v524_v37 = vpop.xlane.xlu0 %523 }
 0x306   : > { %v525_v39 = vcvt.f32.s32 %v524_v37 }
 0x308   : > { %v528_v40 = vadd.s32 %v527_v38, %v525_v39 }
 0x30a   : > { %vm529_vm9 = vcmp.eq.s32.totalorder %v1312_v22, %v528_v40 }
 0x30b   : > { %v530_v41 = vsel %vm529_vm9, -1e+30, %v510_v27 }
 0x30c   : > { %531 = vmax.xlane.f32.xlu2 %v530_v41 }
 0x37f   : > { %v532_v42 = vpop.xlane.xlu2 %531 }
 0x380   : > { %vm533_vm10 = vcmp.eq.f32.partialorder %v530_v41, %v532_v42 }
 0x381   : > { %v534_v43 = vsel %vm533_vm10, %v1312_v22, 128 }
 0x382   : > { %v536_v44 = vshra.s32 %v534_v43, 16  ;;  %v535_v46 = vand.u32 65535, %v534_v43 }
 0x384   : > { %v538_v45 = vcvt.s32.f32 %v536_v44  ;;  %v537_v48 = vcvt.s32.f32 %v535_v46 }
 0x386   : > { %539 = vmin.xlane.f32.xlu2 %v538_v45 }
 0x3f9   : > { %v540_v47 = vpop.xlane.xlu2 %539 }
 0x3fa   : > { %vm541_vm11 = vcmp.eq.f32.partialorder %v538_v45, %v540_v47  ;;  %v546_v50 = vcvt.f32.s32 %v540_v47 }
 0x3fb   : > { %v542_v49 = vsel %vm541_vm11, %v537_v48, inf }
 0x3fc   : > { %543 = vmin.xlane.f32.xlu1 %v542_v49  ;;  %v547_v52 = vshll.u32 %v546_v50, 16 }
 0x46f   : > { %v544_v51 = vpop.xlane.xlu1 %543 }
 0x470   : > { %v545_v53 = vcvt.f32.s32 %v544_v51 }
 0x472   : > { %v548_v54 = vadd.s32 %v547_v52, %v545_v53 }
 0x474   : > { %vm549_vm12 = vcmp.eq.s32.totalorder %v1312_v22, %v548_v54 }
 0x475   : > { %v550_v55 = vsel %vm549_vm12, -1e+30, %v530_v41 }
 0x476   : > { %551 = vmax.xlane.f32.xlu2 %v550_v55 }
 0x4e9   : > { %v552_v56 = vpop.xlane.xlu2 %551 }
 0x4ea   : > { %vm553_vm13 = vcmp.eq.f32.partialorder %v550_v55, %v552_v56 }
 0x4eb   : > { %v554_v57 = vsel %vm553_vm13, %v1312_v22, 128 }
 0x4ec   : > { %v556_v58 = vshra.s32 %v554_v57, 16  ;;  %v555_v60 = vand.u32 65535, %v554_v57 }
 0x4ee   : > { %v558_v59 = vcvt.s32.f32 %v556_v58  ;;  %v557_v62 = vcvt.s32.f32 %v555_v60 }
 0x4f0   : > { %559 = vmin.xlane.f32.xlu0 %v558_v59 }
 0x563   : > { %v560_v61 = vpop.xlane.xlu0 %559 }
 0x564   : > { %vm561_vm14 = vcmp.eq.f32.partialorder %v558_v59, %v560_v61  ;;  %v566_v0 = vcvt.f32.s32 %v560_v61 }
 0x565   : > { %v562_v63 = vsel %vm561_vm14, %v557_v62, inf }
 0x566   : > { %563 = vmin.xlane.f32.xlu1 %v562_v63  ;;  %v567_v2 = vshll.u32 %v566_v0, 16 }
 0x5d9   : > { %v564_v1 = vpop.xlane.xlu1 %563 }
 0x5da   : > { %v565_v3 = vcvt.f32.s32 %v564_v1 }
 0x5dc   : > { %v568_v4 = vadd.s32 %v567_v2, %v565_v3 }
 0x5de   : > { %vm569_vm15 = vcmp.eq.s32.totalorder %v1312_v22, %v568_v4 }
 0x5df   : > { %v570_v5 = vsel %vm569_vm15, -1e+30, %v550_v55 }
 0x5e0   : > { %571 = vmax.xlane.f32.xlu2 %v570_v5 }
 0x653   : > { %v572_v6 = vpop.xlane.xlu2 %571 }
 0x654   : > { %vm573_vm0 = vcmp.eq.f32.partialorder %v570_v5, %v572_v6 }
 0x655   : > { %v574_v7 = vsel %vm573_vm0, %v1312_v22, 128 }
 0x656   : > { %v576_v8 = vshra.s32 %v574_v7, 16  ;;  %v575_v10 = vand.u32 65535, %v574_v7 }
 0x658   : > { %v578_v9 = vcvt.s32.f32 %v576_v8  ;;  %v577_v12 = vcvt.s32.f32 %v575_v10 }
 0x65a   : > { %579 = vmin.xlane.f32.xlu0 %v578_v9 }
 0x6cd   : > { %v580_v11 = vpop.xlane.xlu0 %579 }
 0x6ce   : > { %vm581_vm1 = vcmp.eq.f32.partialorder %v578_v9, %v580_v11  ;;  %v586_v15 = vcvt.f32.s32 %v580_v11 }
 0x6cf   : > { %v582_v14 = vsel %vm581_vm1, %v577_v12, inf }
 0x6d0   : > { %583 = vmin.xlane.f32.xlu1 %v582_v14  ;;  %v587_v18 = vshll.u32 %v586_v15, 16 }
 0x743   : > { %v584_v16 = vpop.xlane.xlu1 %583 }
 0x744   : > { %v585_v19 = vcvt.f32.s32 %v584_v16 }
 0x746   : > { %v588_v20 = vadd.s32 %v587_v18, %v585_v19 }
 0x748   : > { %vm589_vm2 = vcmp.eq.s32.totalorder %v1312_v22, %v588_v20 }
 0x749   : > { %v590_v21 = vsel %vm589_vm2, -1e+30, %v570_v5 }
 0x74a   : > { %591 = vmax.xlane.f32.xlu2 %v590_v21 }
 0x7bd   : > { %v592_v23 = vpop.xlane.xlu2 %591 }
 0x7be   : > { %vm593_vm3 = vcmp.eq.f32.partialorder %v590_v21, %v592_v23 }
 0x7bf   : > { %v594_v27 = vsel %vm593_vm3, %v1312_v22, 128 }
 0x7c0   : > { %v596_v28 = vshra.s32 %v594_v27, 16  ;;  %v595_v30 = vand.u32 65535, %v594_v27 }
 0x7c2   : > { %v598_v29 = vcvt.s32.f32 %v596_v28  ;;  %v597_v32 = vcvt.s32.f32 %v595_v30 }
 0x7c4   : > { %599 = vmin.xlane.f32.xlu0 %v598_v29 }
 0x837   : > { %v600_v31 = vpop.xlane.xlu0 %599 }
 0x838   : > { %vm601_vm4 = vcmp.eq.f32.partialorder %v598_v29, %v600_v31  ;;  %v606_v34 = vcvt.f32.s32 %v600_v31 }
 0x839   : > { %v602_v33 = vsel %vm601_vm4, %v597_v32, inf }
 0x83a   : > { %603 = vmin.xlane.f32.xlu1 %v602_v33  ;;  %v607_v36 = vshll.u32 %v606_v34, 16 }
 0x8ad   : > { %v604_v35 = vpop.xlane.xlu1 %603 }
 0x8ae   : > { %v605_v37 = vcvt.f32.s32 %v604_v35 }
 0x8b0   : > { %v608_v38 = vadd.s32 %v607_v36, %v605_v37 }
 0x8b2   : > { %vm609_vm5 = vcmp.eq.s32.totalorder %v1312_v22, %v608_v38 }
 0x8b3   : > { %v610_v39 = vsel %vm609_vm5, -1e+30, %v590_v21 }
 0x8b4   : > { %611 = vmax.xlane.f32.xlu2 %v610_v39 }
 0x927   : > { %v612_v40 = vpop.xlane.xlu2 %611 }
 0x928   : > { %vm613_vm6 = vcmp.eq.f32.partialorder %v610_v39, %v612_v40 }
 0x929   : > { %v614_v41 = vsel %vm613_vm6, %v1312_v22, 128 }
 0x92a   : > { %v616_v42 = vshra.s32 %v614_v41, 16  ;;  %v615_v44 = vand.u32 65535, %v614_v41 }
 0x92c   : > { %v618_v43 = vcvt.s32.f32 %v616_v42  ;;  %v617_v46 = vcvt.s32.f32 %v615_v44 }
 0x92e   : > { %619 = vmin.xlane.f32.xlu0 %v618_v43 }
 0x9a1   : > { %v620_v45 = vpop.xlane.xlu0 %619 }
 0x9a2   : > { %vm621_vm7 = vcmp.eq.f32.partialorder %v618_v43, %v620_v45  ;;  %v626_v48 = vcvt.f32.s32 %v620_v45 }
 0x9a3   : > { %v622_v47 = vsel %vm621_vm7, %v617_v46, inf }
 0x9a4   : > { %623 = vmin.xlane.f32.xlu1 %v622_v47  ;;  %v627_v50 = vshll.u32 %v626_v48, 16 }
 0xa17   : > { %v624_v49 = vpop.xlane.xlu1 %623 }
 0xa18   : > { %v625_v51 = vcvt.f32.s32 %v624_v49 }
 0xa1a   : > { %v628_v52 = vadd.s32 %v627_v50, %v625_v51 }
 0xa1c   : > { %vm629_vm8 = vcmp.eq.s32.totalorder %v1312_v22, %v628_v52 }
 0xa1d   : > { %v630_v53 = vsel %vm629_vm8, -1e+30, %v610_v39 }
 0xa1e   : > { %631 = vmax.xlane.f32.xlu2 %v630_v53 }
 0xa91   : > { %v632_v54 = vpop.xlane.xlu2 %631 }
 0xa92   : > { %vm633_vm9 = vcmp.eq.f32.partialorder %v630_v53, %v632_v54 }
 0xa93   : > { %v634_v55 = vsel %vm633_vm9, %v1312_v22, 128 }
 0xa94   : > { %v636_v56 = vshra.s32 %v634_v55, 16  ;;  %v635_v58 = vand.u32 65535, %v634_v55 }
 0xa96   : > { %v638_v57 = vcvt.s32.f32 %v636_v56  ;;  %v637_v60 = vcvt.s32.f32 %v635_v58 }
 0xa98   : > { %639 = vmin.xlane.f32.xlu0 %v638_v57 }
 0xb0b   : > { %v640_v59 = vpop.xlane.xlu0 %639 }
 0xb0c   : > { %vm641_vm10 = vcmp.eq.f32.partialorder %v638_v57, %v640_v59  ;;  %v646_v62 = vcvt.f32.s32 %v640_v59 }
 0xb0d   : > { %v642_v61 = vsel %vm641_vm10, %v637_v60, inf }
 0xb0e   : > { %643 = vmin.xlane.f32.xlu1 %v642_v61  ;;  %v647_v0 = vshll.u32 %v646_v62, 16 }
 0xb81   : > { %v644_v63 = vpop.xlane.xlu1 %643 }
 0xb82   : > { %v645_v1 = vcvt.f32.s32 %v644_v63 }
 0xb84   : > { %v648_v2 = vadd.s32 %v647_v0, %v645_v1 }
 0xb86   : > { %vm649_vm11 = vcmp.eq.s32.totalorder %v1312_v22, %v648_v2 }
 0xb87   : > { %v650_v3 = vsel %vm649_vm11, -1e+30, %v630_v53 }
 0xb88   : > { %651 = vmax.xlane.f32.xlu2 %v650_v3 }
 0xbfb   : > { %v652_v4 = vpop.xlane.xlu2 %651 }
 0xbfc   : > { %vm653_vm12 = vcmp.eq.f32.partialorder %v650_v3, %v652_v4 }
 0xbfd   : > { %v654_v5 = vsel %vm653_vm12, %v1312_v22, 128 }
 0xbfe   : > { %v656_v6 = vshra.s32 %v654_v5, 16  ;;  %v655_v8 = vand.u32 65535, %v654_v5 }
 0xc00   : > { %v658_v7 = vcvt.s32.f32 %v656_v6  ;;  %v657_v10 = vcvt.s32.f32 %v655_v8 }
 0xc02   : > { %659 = vmin.xlane.f32.xlu0 %v658_v7 }
 0xc75   : > { %v660_v9 = vpop.xlane.xlu0 %659 }
 0xc76   : > { %vm661_vm13 = vcmp.eq.f32.partialorder %v658_v7, %v660_v9  ;;  %v666_v12 = vcvt.f32.s32 %v660_v9 }
 0xc77   : > { %v662_v11 = vsel %vm661_vm13, %v657_v10, inf }
 0xc78   : > { %663 = vmin.xlane.f32.xlu1 %v662_v11  ;;  %v667_v15 = vshll.u32 %v666_v12, 16 }
 0xceb   : > { %v664_v14 = vpop.xlane.xlu1 %663 }
 0xcec   : > { %v665_v16 = vcvt.f32.s32 %v664_v14 }
 0xcee   : > { %v668_v18 = vadd.s32 %v667_v15, %v665_v16 }
 0xcf0   : > { %vm669_vm14 = vcmp.eq.s32.totalorder %v1312_v22, %v668_v18 }
 0xcf1   : > { %v670_v19 = vsel %vm669_vm14, -1e+30, %v650_v3 }
 0xcf2   : > { %671 = vmax.xlane.f32.xlu2 %v670_v19 }
 0xd65   : > { %v672_v20 = vpop.xlane.xlu2 %671 }
 0xd66   : > { %vm673_vm15 = vcmp.eq.f32.partialorder %v670_v19, %v672_v20 }
 0xd67   : > { %v674_v21 = vsel %vm673_vm15, %v1312_v22, 128 }
 0xd68   : > { %v676_v23 = vshra.s32 %v674_v21, 16  ;;  %v675_v28 = vand.u32 65535, %v674_v21 }
 0xd6a   : > { %v678_v27 = vcvt.s32.f32 %v676_v23  ;;  %v677_v30 = vcvt.s32.f32 %v675_v28  ;;  %v337_v23 = vld [vmem:[%s317_s17] sm:$0xff] }
 0xd6c   : > { %679 = vmin.xlane.f32.xlu0 %v678_v27 }
 0xddf   : > { %v680_v29 = vpop.xlane.xlu0 %679 }
 0xde0   : > { %vm681_vm0 = vcmp.eq.f32.partialorder %v678_v27, %v680_v29  ;;  %v686_v32 = vcvt.f32.s32 %v680_v29 }
 0xde1   : > { %v682_v31 = vsel %vm681_vm0, %v677_v30, inf }
 0xde2   : > { %683 = vmin.xlane.f32.xlu1 %v682_v31  ;;  %v687_v34 = vshll.u32 %v686_v32, 16 }
 0xe55   : > { %v684_v33 = vpop.xlane.xlu1 %683 }
 0xe56   : > { %v685_v35 = vcvt.f32.s32 %v684_v33 }
 0xe58   : > { %v688_v36 = vadd.s32 %v687_v34, %v685_v35 }
 0xe5a   : > { %vm689_vm1 = vcmp.eq.s32.totalorder %v1312_v22, %v688_v36 }
 0xe5b   : > { %v690_v37 = vsel %vm689_vm1, -1e+30, %v670_v19 }
 0xe5c   : > { %691 = vmax.xlane.f32.xlu2 %v690_v37 }
 0xecf   : > { %v692_v38 = vpop.xlane.xlu2 %691 }
 0xed0   : > { %vm693_vm2 = vcmp.eq.f32.partialorder %v690_v37, %v692_v38 }
 0xed1   : > { %v694_v39 = vsel %vm693_vm2, %v1312_v22, 128 }
 0xed2   : > { %v696_v40 = vshra.s32 %v694_v39, 16  ;;  %v695_v42 = vand.u32 65535, %v694_v39 }
 0xed4   : > { %v698_v41 = vcvt.s32.f32 %v696_v40  ;;  %v697_v44 = vcvt.s32.f32 %v695_v42 }
 0xed6   : > { %699 = vmin.xlane.f32.xlu0 %v698_v41 }
 0xf49   : > { %v700_v43 = vpop.xlane.xlu0 %699 }
 0xf4a   : > { %vm701_vm3 = vcmp.eq.f32.partialorder %v698_v41, %v700_v43  ;;  %v706_v46 = vcvt.f32.s32 %v700_v43 }
 0xf4b   : > { %v702_v45 = vsel %vm701_vm3, %v697_v44, inf }
 0xf4c   : > { %703 = vmin.xlane.f32.xlu1 %v702_v45  ;;  %v707_v48 = vshll.u32 %v706_v46, 16 }
 0xfbf   : > { %v704_v47 = vpop.xlane.xlu1 %703 }
 0xfc0   : > { %v705_v49 = vcvt.f32.s32 %v704_v47 }
 0xfc2   : > { %v708_v50 = vadd.s32 %v707_v48, %v705_v49 }
 0xfc4   : > { %vm709_vm4 = vcmp.eq.s32.totalorder %v1312_v22, %v708_v50 }
 0xfc5   : > { %v710_v51 = vsel %vm709_vm4, -1e+30, %v690_v37 }
 0xfc6   : > { %711 = vmax.xlane.f32.xlu2 %v710_v51 }
0x1039   : > { %v712_v52 = vpop.xlane.xlu2 %711 }
0x103a   : > { %vm713_vm5 = vcmp.eq.f32.partialorder %v710_v51, %v712_v52 }
0x103b   : > { %v714_v53 = vsel %vm713_vm5, %v1312_v22, 128 }
0x103c   : > { %v716_v54 = vshra.s32 %v714_v53, 16  ;;  %v715_v56 = vand.u32 65535, %v714_v53 }
0x103e   : > { %v718_v55 = vcvt.s32.f32 %v716_v54  ;;  %v717_v58 = vcvt.s32.f32 %v715_v56 }
0x1040   : > { %719 = vmin.xlane.f32.xlu0 %v718_v55 }
0x10b3   : > { %v720_v57 = vpop.xlane.xlu0 %719 }
0x10b4   : > { %vm721_vm6 = vcmp.eq.f32.partialorder %v718_v55, %v720_v57  ;;  %v726_v60 = vcvt.f32.s32 %v720_v57 }
0x10b5   : > { %v722_v59 = vsel %vm721_vm6, %v717_v58, inf }
0x10b6   : > { %723 = vmin.xlane.f32.xlu1 %v722_v59  ;;  %v727_v62 = vshll.u32 %v726_v60, 16 }
0x1129   : > { %v724_v61 = vpop.xlane.xlu1 %723 }
0x112a   : > { %v725_v63 = vcvt.f32.s32 %v724_v61 }
0x112c   : > { %v728_v0 = vadd.s32 %v727_v62, %v725_v63 }
0x112e   : > { %vm729_vm7 = vcmp.eq.s32.totalorder %v1312_v22, %v728_v0 }
0x112f   : > { %v730_v1 = vsel %vm729_vm7, -1e+30, %v710_v51 }
0x1130   : > { %731 = vmax.xlane.f32.xlu2 %v730_v1 }
0x11a3   : > { %v732_v2 = vpop.xlane.xlu2 %731 }
0x11a4   : > { %vm733_vm8 = vcmp.eq.f32.partialorder %v730_v1, %v732_v2 }
0x11a5   : > { %v734_v3 = vsel %vm733_vm8, %v1312_v22, 128 }
0x11a6   : > { %v736_v4 = vshra.s32 %v734_v3, 16  ;;  %v735_v6 = vand.u32 65535, %v734_v3 }
0x11a8   : > { %v738_v5 = vcvt.s32.f32 %v736_v4  ;;  %v737_v8 = vcvt.s32.f32 %v735_v6 }
0x11aa   : > { %739 = vmin.xlane.f32.xlu0 %v738_v5 }
0x121d   : > { %v740_v7 = vpop.xlane.xlu0 %739 }
0x121e   : > { %vm741_vm9 = vcmp.eq.f32.partialorder %v738_v5, %v740_v7  ;;  %v746_v10 = vcvt.f32.s32 %v740_v7 }
0x121f   : > { %v742_v9 = vsel %vm741_vm9, %v737_v8, inf }
0x1220   : > { %743 = vmin.xlane.f32.xlu1 %v742_v9  ;;  %v747_v12 = vshll.u32 %v746_v10, 16 }
0x1293   : > { %v744_v11 = vpop.xlane.xlu1 %743 }
0x1294   : > { %v745_v14 = vcvt.f32.s32 %v744_v11 }
0x1296   : > { %v748_v15 = vadd.s32 %v747_v12, %v745_v14 }
0x1298   : > { %vm749_vm10 = vcmp.eq.s32.totalorder %v1312_v22, %v748_v15 }
0x1299   : > { %v750_v16 = vsel %vm749_vm10, -1e+30, %v730_v1 }
0x129a   : > { %751 = vmax.xlane.f32.xlu2 %v750_v16 }
0x12b2   : > { %776 = vperm.xlu2 %1093, %v337_v23  }
0x130d   : > { %v752_v18 = vpop.xlane.xlu2 %751 }
0x130e   : > { %vm753_vm11 = vcmp.eq.f32.partialorder %v750_v16, %v752_v18 }
0x130f   : > { %v754_v19 = vsel %vm753_vm11, %v1312_v22, 128 }
0x1310   : > { %v756_v20 = vshra.s32 %v754_v19, 16  ;;  %v755_v27 = vand.u32 65535, %v754_v19 }
0x1312   : > { %v758_v21 = vcvt.s32.f32 %v756_v20  ;;  %v757_v29 = vcvt.s32.f32 %v755_v27 }
0x1314   : > { %759 = vmin.xlane.f32.xlu0 %v758_v21 }
0x1315   : > { %v777_v37 = vpop.permute.xlu2 %776 }
0x1387   : > { %v760_v28 = vpop.xlane.xlu0 %759 }
0x1388   : > { %vm761_vm12 = vcmp.eq.f32.partialorder %v758_v21, %v760_v28  ;;  %v766_v31 = vcvt.f32.s32 %v760_v28 }
0x1389   : > { %v762_v30 = vsel %vm761_vm12, %v757_v29, inf }
0x138a   : > { %763 = vmin.xlane.f32.xlu1 %v762_v30  ;;  %v767_v33 = vshll.u32 %v766_v31, 16 }
0x13fd   : > { %v764_v32 = vpop.xlane.xlu1 %763 }
0x13fe   : > { %v765_v34 = vcvt.f32.s32 %v764_v32 }
0x1400   : > { %v768_v35 = vadd.s32 %v767_v33, %v765_v34 }
0x1402   : > { %vm769_vm13 = vcmp.eq.s32.totalorder %v1312_v22, %v768_v35 }
0x1403   : > { %v770_v36 = vsel %vm769_vm13, -1e+30, %v750_v16 }
0x1404   : > { %vm771_vm14 = vcmp.lt.f32.partialorder %v770_v36, -1e+29 }
0x1405   : > { %v1031_v38 = vsel %vm771_vm14, 1.0, %v1166_v24 }
0x1406   : > { %v779_v39 = vmul.f32 %v1031_v38, %v777_v37 }
0x1408   : > { %v780_v40 = vmul.f32 %v1332_v26, %v779_v39 }
0x140a   : > { %v781_v41 = vrot.slane %v780_v40, 4  ;;  %787 = vst [vmem:[#allocation2] sm:$0xff] %v780_v40 }
0x140c   : > { %v782_v42 = vadd.f32 %v781_v41, %v780_v40 }
0x140e   : > { %v783_v43 = vrot.slane %v782_v42, 2 }
0x1410   : > { %v784_v44 = vadd.f32 %v783_v43, %v782_v42 }
0x1412   : > { %v785_v45 = vrot.slane %v784_v44, 1 }
0x1414   : > { %v786_v46 = vadd.f32 %v785_v45, %v784_v44 }
0x1416   : > { %789 = vmax.xlane.f32.xlu0 %v786_v46  ;;  %788 = vst [vmem:[%s1371_s19] sm:$0x1] %v786_v46 }
0x1489   : > { %v790_v22 = vpop.xlane.xlu0 %789 }
0x148a   : > { %1038 = vpush %v790_v22 }
0x14bb   : > { %s1039_s20 = spop %1038 }
0x14bc   : > { %p792_p11 = scmp.gt.f32.partialorder %s1039_s20, 1.0 }
0x14bd   : > { %v796_v24 = vrot.slane (%p792_p11), %v1325_v17, 4  ;;  %vm816_vm3 = vcmp.gt.f32.partialorder (%p792_p11), %v786_v46, 1.0  ;;  %v1170_v58 = vmov (%p792_p11), 0.0  }
0x14be   : > { %795 = sbr.rel (!%p792_p11) target bundleno = 5351 (0x14e7), region = 48 }
0x14bf   : > { %v797_v26 = vmax.f32 (%p792_p11), %v1325_v17, %v796_v24 }
0x14c1   : > { %v798_v47 = vrot.slane (%p792_p11), %v797_v26, 2 }
0x14c3   : > { %v799_v48 = vmax.f32 %v797_v26, %v798_v47 }
0x14c5   : > { %v800_v49 = vrot.slane %v799_v48, 1 }
0x14c7   : > { %v801_v50 = vmax.f32 %v799_v48, %v800_v49 }
0x14c9   : > { %vm802_vm15 = vcmp.eq.f32.partialorder %v1325_v17, %v801_v50 }
0x14ca   : > { %v803_v51 = vsel %vm802_vm15, %v1294_v13, 8 }
0x14cb   : > { %v804_v52 = vrot.slane %v803_v51, 4 }
0x14cd   : > { %vm805_vm0 = vcmp.lt.s32.totalorder %v803_v51, %v804_v52 }
0x14ce   : > { %v806_v53 = vsel %vm805_vm0, %v803_v51, %v804_v52 }
0x14cf   : > { %v807_v54 = vrot.slane %v806_v53, 2 }
0x14d1   : > { %vm808_vm1 = vcmp.lt.s32.totalorder %v806_v53, %v807_v54 }
0x14d2   : > { %v809_v55 = vsel %vm808_vm1, %v806_v53, %v807_v54 }
0x14d3   : > { %v810_v56 = vrot.slane %v809_v55, 1 }
0x14d5   : > { %vm811_vm2 = vcmp.lt.s32.totalorder %v809_v55, %v810_v56 }
0x14d6   : > { %v812_v57 = vsel %vm811_vm2, %v809_v55, %v810_v56 }
0x14d7   : > { %vm813_vm4 = vcmp.eq.s32.totalorder %v1294_v13, %v812_v57 }
0x14d8   : > { %v1032_v59 = vsel %vm813_vm4, 1.0, %v1170_v58 }
0x14d9   : > { %v819_v60 = vsel %vm816_vm3, %v1032_v59, %v780_v40 }
0x14da   : > { %820 = vst [vmem:[#allocation2] sm:$0xff] %v819_v60  ;;  %v821_v61 = vrot.slane %v819_v60, 4 }
0x14dc   : > { %v822_v62 = vadd.f32 %v821_v61, %v819_v60 }
0x14de   : > { %v823_v63 = vrot.slane %v822_v62, 2 }
0x14e0   : > { %v824_v0 = vadd.f32 %v823_v63, %v822_v62 }
0x14e2   : > { %v825_v1 = vrot.slane %v824_v0, 1 }
0x14e4   : > { %v826_v2 = vadd.f32 %v825_v1, %v824_v0 }
0x14e6   : > { %827 = vst [vmem:[%s1371_s19] sm:$0x1] %v826_v2 }
0x14e7 PF: > { %v828_v3 = vld [vmem:[#allocation2] sm:$0xff]  ;;  %s1034_s26 = sshll.u32 %s1227_s25, 3  ;;  %s891_s12 = sshll.u32 %s1371_s19, 4  ;;  %s892_s12 = int_to_ptr.vmem [resolvable:$true] %s891_s12 }
0x14e8   : > { %v846_v4 = vmul.f32 %v828_v3, %v1329_v25  ;;  %v849_v5 = vmul.f32 %v828_v3, %v1325_v17  ;;  %v829_v6 = vrot.slane %v828_v3, 4  ;;  %s889_s11 = scalar_lea.hbm %s1425_s6, %s1034_s26  ;;  %s879_s9 = scalar_lea.sflag [#allocation4], %s294_s10 }
0x14e9   : > { %s893_s13 = sshll.u32 %s889_s11, 4  ;;  %s1119_s17 = scalar_lea.hbm %s1425_s6, 16  ;;  %s894_s13 = int_to_ptr.hbm [resolvable:$true] %s893_s13 }
0x14ea   : > { %847 = vmax.xlane.f32.xlu0 %v846_v4  ;;  %v830_v7 = vmax.f32 %v828_v3, %v829_v6  ;;  %s1113_s14 = sshra.s32 %s894_s13, 4  ;;  %s1114_s14 = int_to_ptr.hbm [resolvable:$true] %s1113_s14 }
0x14eb   : > { %s1115_s25 = scalar_lea.hbm %s1114_s14, 8  ;;  %p1120_p1 = scmp.lt.s32.totalorder %s1114_s14, %s1425_s6 }
0x14ec   : > { %v831_v8 = vrot.slane %v830_v7, 2  ;;  %p1116_p12 = scmp.ne.s32.totalorder %s1114_s14, %s1115_s25  ;;  %p1121_p2 = scmp.lt.s32.totalorder %s1119_s17, %s1115_s25 }
0x14ee   : > { %v832_v9 = vmax.f32 %v830_v7, %v831_v8  ;;  %p1117_p13 = pnand %p1116_p12, %p1244_p5  ;;  %p1122_p3 = por %p1121_p2, %p1120_p1 }
0x14f0   : > { %v833_v10 = vrot.slane %v832_v9, 1  ;;  %p1118_p0 = pneg %p1117_p13 }
0x14f2   : > { %850 = vmax.xlane.f32.xlu0 %v849_v5  ;;  %v834_v11 = vmax.f32 %v832_v9, %v833_v10  ;;  %p1123_p4 = pnand %p1122_p3, %p1118_p0 }
0x14f4   : > { %vm835_vm5 = vcmp.eq.f32.partialorder %v828_v3, %v834_v11 }
0x14f5   : > { %v836_v12 = vsel %vm835_vm5, %v1294_v13, 8 }
0x14f6   : > { %v837_v14 = vrot.slane %v836_v12, 4 }
0x14f8   : > { %vm838_vm6 = vcmp.lt.s32.totalorder %v836_v12, %v837_v14 }
0x14f9   : > { %v839_v15 = vsel %vm838_vm6, %v836_v12, %v837_v14 }
0x14fa   : > { %v840_v16 = vrot.slane %v839_v15, 2 }
0x14fc   : > { %vm841_vm7 = vcmp.lt.s32.totalorder %v839_v15, %v840_v16 }
0x14fd   : > { %v842_v25 = vsel %vm841_vm7, %v839_v15, %v840_v16 }
0x14fe   : > { %v843_v18 = vrot.slane %v842_v25, 1 }
0x1500   : > { %vm844_vm8 = vcmp.lt.s32.totalorder %v842_v25, %v843_v18 }
0x1501   : > { %v845_v20 = vsel %vm844_vm8, %v842_v25, %v843_v18 }
0x1502   : > { %v876_v21 = vcvt.s32.f32 %v845_v20 }
0x1504   : > { %877 = vst [vmem:[%s1371_s19 + $0x2] sm:$0x1] %v876_v21 }
0x155d   : > { %v848_v19 = vpop.xlane.xlu0 %847 }
0x155e   : > { %v852_v17 = vadd.f32 1e-09, %v848_v19 }
0x1560   : > { %1097 = vrcp.f32 %v852_v17  ;;  %v864_v29 = vand.u32 2147483648, %v852_v17  ;;  %v862_v30 = vand.u32 2147483647, %v852_v17  ;;  %vm858_vm10 = vweird.f32 %v852_v17 }
0x1562   : > { %v865_v32 = vor.u32 1.1754944e-38, %v864_v29  ;;  %vm863_vm12 = vcmp.eq.f32.partialorder %v862_v30, 8.507059e+37 }
0x1565   : > { %v851_v33 = vpop.xlane.xlu0 %850 }
0x1566   : > { %v1098_v23 = vpop.eup %1097 }
0x1567   : > { %v854_v27 = vmul.f32 %v1098_v23, %v852_v17  ;;  %vm859_vm9 = vweird.f32 %v1098_v23 }
0x1568   : > { %vm860_vm11 = vmor %vm858_vm10, %vm859_vm9 }
0x1569   : > { %v855_v28 = vsub.f32 1.0, %v854_v27 }
0x156b   : > { %v856_v13 = vmul.f32 %v1098_v23, %v855_v28 }
0x156d   : > { %v857_v31 = vadd.f32 %v1098_v23, %v856_v13 }
0x156f   : > { %v861_v34 = vsel %vm860_vm11, %v1098_v23, %v857_v31 }
0x1570   : > { %v866_v35 = vsel %vm863_vm12, %v865_v32, %v861_v34 }
0x1571   : > { %v867_v36 = vmul.f32 %v866_v35, %v851_v33 }
0x1573   : > { %v868_v37 = vmul.f32 %v867_v36, %v846_v4 }
0x1575   : > { %v869_v38 = vrot.slane %v868_v37, 4 }
0x1577   : > { %v870_v39 = vmax.f32 %v868_v37, %v869_v38 }
0x1579   : > { %v871_v40 = vrot.slane %v870_v39, 2 }
0x157b   : > { %v872_v41 = vmax.f32 %v870_v39, %v871_v40 }
0x157d   : > { %v873_v42 = vrot.slane %v872_v41, 1 }
0x157f   : > { %v874_v43 = vmax.f32 %v872_v41, %v873_v42 }
0x1581   : > { %875 = vst [vmem:[%s1371_s19 + $0x1] sm:$0x1] %v874_v43 }
0x1582   : > { %1126 = shalt.err (!%p1123_p4)
}
0x1583   : > { %1040 = dma.vmem_to_hbm [thread:$0]  (%p1244_p5), %s892_s12, 128, %s894_s13, %s879_s9  }
0x1584 PF: > { %p1046_p7 = scmp.ge.s32.totalorder %s1161_s24, 2  ;;  %s905_s10 = sand.u32 1, %s1149_s21  }
0x1585   : > { %s906_s19 = scalar_lea.sflag [#allocation4], %s905_s10 }
0x1586   : > { %p1043_p8 = pnand %p1046_p7, %p1248_p6 }
0x1588   : > { %p1044_p9 = pneg %p1043_p8 }
0x158a   : > { %1144 = dma.done.wait (%p1044_p9), %s906_s19, 128  }
0x158b   : > { %1146 = vsyncadd (%p1044_p9), %s906_s19, 4294967168  ;;  %p16_p10 = scmp.ge.s32.totalorder %s1231_s27, 4   ;;  %s1428_s21 = smov %s1153_s22 }
0x158c   : > { %s1429_s22 = smov %s1157_s23  ;;  %s1430_s23 = smov %s1242_s30 }
0x158d   : > { %s1431_s24 = smov %s1231_s27  ;;  %18 = sbr.rel (!%p16_p10) target bundleno = 3 (0x3), region = 95 }
0x1592   :  { %912 = vsyncpa [#allocation4], 1 }
0x1593   :  { %914 = vsyncpa [#allocation4 + $0x1], 1 }

</bundles_post_ra>
